<compile_context>
chip_gen: v5e
topology: v5e:2x2
jax: 0.10.0
libtpu: 0.0.40
codegen_flags: <defaults>
</compile_context>

<pallas_src>
import functools

import jax
import jax.numpy as jnp
import numpy as np
from jax.experimental import pallas as pl
from jax.experimental.pallas import tpu as pltpu

LANE = 128


def _round_up(n, m):
    return -(-n // m) * m


def _idiv(x, d):
    """x // d for a traced int32 vector and a static positive python int."""
    if (d & (d - 1)) == 0:
        return x >> (int(d).bit_length() - 1)
    return x // d   # TODO(synk): relies on vector integer division support.


def _imod(x, d):
    if (d & (d - 1)) == 0:
        return x & (d - 1)
    return x - _idiv(x, d) * d


# ------------------------------ in-kernel helpers --------------------------- #

def _upsample_coarse(prev_lat, h, w, hwp_c, H, W, HWp, cout):
    """Nearest-neighbour upsample of the coarser combined lateral (f32,
    flattened pixels on lanes, lane-padded) to this level's (H, W).
    h extraction rolls -> one tiny (w, HWp) 0/1 row-stretch matmul (matrix
    generated from iota in-kernel) -> H placement rolls.  No big matrix."""
    rows = []
    for r in range(h):
        rr = prev_lat if r == 0 else pltpu.roll(
            prev_lat, shift=(-(r * w)) % hwp_c, axis=1)
        rows.append(rr[:, :w])                                    # (Cout, w)
    stacked = jnp.concatenate(rows, axis=0).astype(jnp.bfloat16)  # (h*Cout, w)

    # 0/1 row-stretch matrix: fine column X reads coarse column (X*w)//W.
    ri = jax.lax.broadcasted_iota(jnp.int32, (w, HWp), 0)
    ci = jax.lax.broadcasted_iota(jnp.int32, (w, HWp), 1)
    if W % w == 0:
        src = _idiv(ci, W // w)
    else:
        src = _idiv(ci * w, W)
    qx = ((ci < W) & (src == ri)).astype(jnp.bfloat16)            # (w, HWp)

    expanded = jnp.dot(stacked, qx,
                       preferred_element_type=jnp.float32)        # (h*Cout, HWp)
    up = jnp.zeros((cout, HWp), jnp.float32)
    for y in range(H):
        r = (y * h) // H
        piece = expanded[r * cout:(r + 1) * cout, :]              # (Cout, HWp)
        up = up + (piece if y == 0 else pltpu.roll(piece, shift=y * W, axis=1))
    return up


# --------------------------------- kernel ----------------------------------- #

def _fpn_fused_kernel(*refs, dims, cout):
    """Whole FPN neck for one batch element, coarsest -> finest level.

    Per level (channels on sublanes, flattened pixels on lanes):
      lat  = relu(w_lat_scaled @ x + b_lat)              # 1x1 conv (BN folded)
      lat += nearest_upsample(prev_lat)                  # top-down pathway
      out  = relu(w_fpn_scaled @ tap_stack(lat) + b_fpn) # 3x3 conv, one K=72 dot
    """
    L = len(dims)
    x_refs = refs[:L]
    wlat_refs = refs[L:2 * L]
    wfpn_ref = refs[2 * L]
    bias_ref = refs[2 * L + 1]
    out_refs = refs[2 * L + 2:2 * L + 2 + L]
    lat_scr = refs[-1]

    prev = None   # (combined lateral value f32 (Cout, HWp), h, w, hwp) of coarser level
    for li in range(L - 1, -1, -1):
        _, H, W, HW, HWp = dims[li]
        bias = bias_ref[li]                                       # (Cout, 2) f32

        # ---- lateral 1x1 conv (BN scale folded into weights) + bias + ReLU ----
        x = x_refs[li][0].astype(jnp.bfloat16)                    # (Cin, HW)
        lat = jnp.dot(wlat_refs[li][...], x,
                      preferred_element_type=jnp.float32)         # (Cout, HW)
        lat = jnp.maximum(lat + bias[:, 0:1], 0.0)

        # ---- pad flattened pixels to a multiple of 128 lanes (for the rolls) ----
        if HW == HWp:
            lat_p = lat
        else:
            lat_scr[...] = jnp.zeros_like(lat_scr)
            lat_scr[:, :HW] = lat
            lat_p = lat_scr[:, :HWp]                              # (Cout, HWp)

        # ---- fused top-down pathway: nearest-upsample coarser lateral + add ----
        if prev is not None:
            prev_lat, ph, pw, phwp = prev
            lat_p = lat_p + _upsample_coarse(prev_lat, ph, pw, phwp,
                                             H, W, HWp, cout)

        # ---- 3x3 fpn conv: 9 rolled + masked taps stacked -> one K=72 matmul ----
        idx = jax.lax.broadcasted_iota(jnp.int32, (cout, HWp), 1)
        row = _idiv(idx, W)
        col = _imod(idx, W)
        taps = []
        for t in range(9):
            dy, dx = t // 3 - 1, t % 3 - 1
            off = dy * W + dx
            shifted = lat_p if off == 0 else pltpu.roll(
                lat_p, shift=(-off) % HWp, axis=1)
            valid = ((row + dy >= 0) & (row + dy < H) &
                     (col + dx >= 0) & (col + dx < W))
            taps.append(jnp.where(valid, shifted, jnp.zeros_like(shifted)))
        stack = jnp.concatenate(taps, axis=0).astype(jnp.bfloat16)  # (9*Cout, HWp)
        out = jnp.dot(wfpn_ref[li], stack,
                      preferred_element_type=jnp.float32)           # (Cout, HWp)
        out = jnp.maximum(out + bias[:, 1:2], 0.0)
        out_refs[li][0] = out[:, :HW]                                # unpadded store

        prev = (lat_p, H, W, HWp)


# ------------------------------- FPN forward -------------------------------- #

def fpn_forward(inputs_nchw, params):
    """FPN forward. NCHW in / NCHW out; the whole pyramid is one fused
    Pallas call, grid over the batch."""
    L = len(inputs_nchw)
    N = inputs_nchw[0].shape[0]
    cout = params["lateral"][0]["w"].shape[0]

    dims, xs, wlats = [], [], []
    for i, x in enumerate(inputs_nchw):
        _, cin, H, W = x.shape
        HW = H * W
        HWp = _round_up(HW, LANE)
        dims.append((cin, H, W, HW, HWp))
        xs.append(x.reshape(N, cin, HW))        # free reshape, no pad/cast copy
        p = params["lateral"][i]
        wlats.append((p["w"].reshape(cout, cin) * p["scale"][:, None])
                     .astype(jnp.bfloat16))

    # TODO(synk): in deployment these weight/bias packs are hoisted out of the step.
    wfpn = jnp.stack(
        [(jnp.transpose(params["fpn"][i]["w"], (0, 2, 3, 1)).reshape(cout, 9 * cout)
          * params["fpn"][i]["scale"][:, None]).astype(jnp.bfloat16)
         for i in range(L)], axis=0)                                   # (L, Cout, 72)
    bias = jnp.stack(
        [jnp.stack([params["lateral"][i]["bias"], params["fpn"][i]["bias"]], axis=1)
         for i in range(L)], axis=0).astype(jnp.float32)               # (L, Cout, 2)

    hwp_max = max(d[4] for d in dims)
    kernel = functools.partial(_fpn_fused_kernel, dims=tuple(dims), cout=cout)

    in_specs = (
        [pl.BlockSpec((1, d[0], d[3]), lambda n: (n, 0, 0)) for d in dims] +
        [pl.BlockSpec((cout, d[0]), lambda n: (0, 0)) for d in dims] +
        [pl.BlockSpec((L, cout, 9 * cout), lambda n: (0, 0, 0)),
         pl.BlockSpec((L, cout, 2), lambda n: (0, 0, 0))])
    out_shape = tuple(jax.ShapeDtypeStruct((N, cout, d[3]), jnp.float32) for d in dims)
    out_specs = [pl.BlockSpec((1, cout, d[3]), lambda n: (n, 0, 0)) for d in dims]

    outs = pl.pallas_call(
        kernel,
        out_shape=out_shape,
        grid_spec=pltpu.PrefetchScalarGridSpec(
            num_scalar_prefetch=0,
            grid=(N,),                                  # batch -> 2 TCs on v7x
            in_specs=in_specs,
            out_specs=out_specs,
            scratch_shapes=[pltpu.VMEM((cout, hwp_max), jnp.float32)]),
        compiler_params=pltpu.CompilerParams(
            dimension_semantics=("parallel",)),
    )(*xs, *wlats, wfpn, bias)

    return tuple(outs[i].reshape(N, cout, dims[i][1], dims[i][2]) for i in range(L))


# ---------------------------- Parameter helpers ----------------------------- #

def xavier_uniform(key, shape):
    # shape = (Cout, Cin, kh, kw), matches nn.init.xavier_uniform_
    fan_out = shape[0] * shape[2] * shape[3]
    fan_in = shape[1] * shape[2] * shape[3]
    bound = float(np.sqrt(6.0 / (fan_in + fan_out)))
    return jax.random.uniform(key, shape, jnp.float32, -bound, bound)


def bn_affine(key, c, eps=1e-5):
    # Deterministic (eval-mode) BatchNorm folded into scale/bias.
    k1, k2, k3, k4 = jax.random.split(key, 4)
    gamma = 1.0 + 0.1 * jax.random.normal(k1, (c,), jnp.float32)
    beta = 0.1 * jax.random.normal(k2, (c,), jnp.float32)
    mean = 0.1 * jax.random.normal(k3, (c,), jnp.float32)
    var = 1.0 + 0.1 * jnp.abs(jax.random.normal(k4, (c,), jnp.float32))
    scale = gamma / jnp.sqrt(var + eps)
    bias = beta - mean * scale
    return scale, bias


# --------------------------- Pure-JAX reference ----------------------------- #

def _ref_conv_bn_relu(x_nchw, w, scale, bias, padding):
    y = jax.lax.conv_general_dilated(
        x_nchw, w, (1, 1), padding,
        dimension_numbers=("NCHW", "OIHW", "NCHW"))
    y = y * scale[None, :, None, None] + bias[None, :, None, None]
    return jnp.maximum(y, 0.0)


def ref_fpn(inputs_nchw, params):
    laterals = []
    for i, x in enumerate(inputs_nchw):
        p = params["lateral"][i]
        laterals.append(_ref_conv_bn_relu(x, p["w"], p["scale"], p["bias"], "SAME"))
    for i in range(len(laterals) - 1, 0, -1):
        H, W = laterals[i - 1].shape[2:]
        h, w = laterals[i].shape[2:]
        up = jnp.repeat(jnp.repeat(laterals[i], H // h, axis=2), W // w, axis=3)
        laterals[i - 1] = laterals[i - 1] + up
    outs = []
    for i, lat in enumerate(laterals):
        p = params["fpn"][i]
        outs.append(_ref_conv_bn_relu(lat, p["w"], p["scale"], p["bias"], "SAME"))
    return tuple(outs)


# ----------------------------------- Main ------------------------------------ #

if __name__ == "__main__":
    key = jax.random.PRNGKey(0)

    in_channels = [4, 8, 16]
    out_channels = 8
    spatial = [16, 8, 4]
    N = 2

    params = {"lateral": [], "fpn": []}
    for cin in in_channels:
        key, kw, kbn = jax.random.split(key, 3)
        w = xavier_uniform(kw, (out_channels, cin, 1, 1))
        scale, bias = bn_affine(kbn, out_channels)
        params["lateral"].append({"w": w, "scale": scale, "bias": bias})
    for _ in in_channels:
        key, kw, kbn = jax.random.split(key, 3)
        w = xavier_uniform(kw, (out_channels, out_channels, 3, 3))
        scale, bias = bn_affine(kbn, out_channels)
        params["fpn"].append({"w": w, "scale": scale, "bias": bias})

    inputs = []
    for cin, s in zip(in_channels, spatial):
        key, kx = jax.random.split(key)
        inputs.append(jax.random.normal(kx, (N, cin, s, s), jnp.float32))

    outs = fpn_forward(inputs, params)
    outs = jax.block_until_ready(outs)

    refs = ref_fpn(inputs, params)
    for o, r in zip(outs, refs):
        assert o.shape == r.shape and o.dtype == r.dtype
        # Tolerance reflects bf16 MXU inputs (accumulation, upsample carry and
        # BN-bias/ReLU epilogues stay in f32).
        np.testing.assert_allclose(np.asarray(o), np.asarray(r),
                                   atol=6e-2, rtol=6e-2)

    print("KERNEL_OK")
</pallas_src>

<mosaic_0001>
module attributes {stable_mosaic.version = 11 : i64} {
  func.func @_fpn_fused_kernel(%arg0: i32, %arg1: memref<1x4x256xf32, #tpu.memory_space<vmem>>, %arg2: memref<1x8x64xf32, #tpu.memory_space<vmem>>, %arg3: memref<1x16x16xf32, #tpu.memory_space<vmem>>, %arg4: memref<8x4xbf16, #tpu.memory_space<vmem>>, %arg5: memref<8x8xbf16, #tpu.memory_space<vmem>>, %arg6: memref<8x16xbf16, #tpu.memory_space<vmem>>, %arg7: memref<3x8x72xbf16, #tpu.memory_space<vmem>>, %arg8: memref<3x8x2xf32, #tpu.memory_space<vmem>>, %arg9: memref<1x8x256xf32, #tpu.memory_space<vmem>>, %arg10: memref<1x8x64xf32, #tpu.memory_space<vmem>>, %arg11: memref<1x8x16xf32, #tpu.memory_space<vmem>>, %arg12: memref<8x256xf32, #tpu.memory_space<vmem>>) attributes {dimension_semantics = [#tpu.dimension_semantics<parallel>], iteration_bounds = array<i64: 2>, scalar_prefetch = 0 : i64, scratch_operands = 1 : i64, tpu.core_type = #tpu.core_type<tc>, window_params = [{transform_indices = @transform_0, window_bounds = array<i64: 1, 4, 256>}, {transform_indices = @transform_1, window_bounds = array<i64: 1, 8, 64>}, {transform_indices = @transform_2, window_bounds = array<i64: 1, 16, 16>}, {pipeline_mode = #tpu.pipeline_mode<synchronous>, transform_indices = @transform_3, window_bounds = array<i64: 8, 4>}, {pipeline_mode = #tpu.pipeline_mode<synchronous>, transform_indices = @transform_4, window_bounds = array<i64: 8, 8>}, {pipeline_mode = #tpu.pipeline_mode<synchronous>, transform_indices = @transform_5, window_bounds = array<i64: 8, 16>}, {pipeline_mode = #tpu.pipeline_mode<synchronous>, transform_indices = @transform_6, window_bounds = array<i64: 3, 8, 72>}, {pipeline_mode = #tpu.pipeline_mode<synchronous>, transform_indices = @transform_7, window_bounds = array<i64: 3, 8, 2>}, {transform_indices = @transform_8, window_bounds = array<i64: 1, 8, 256>}, {transform_indices = @transform_9, window_bounds = array<i64: 1, 8, 64>}, {transform_indices = @transform_10, window_bounds = array<i64: 1, 8, 16>}]} {
    %c2 = arith.constant 2 : index
    %c0 = arith.constant 0 : index
    %c0_0 = arith.constant 0 : index
    %0 = vector.load %arg8[%c2, %c0, %c0_0] : memref<3x8x2xf32, #tpu.memory_space<vmem>>, vector<1x8x2xf32>
    %1 = vector.shape_cast %0 : vector<1x8x2xf32> to vector<8x2xf32>
    %c0_1 = arith.constant 0 : index
    %c0_2 = arith.constant 0 : index
    %c0_3 = arith.constant 0 : index
    %2 = vector.load %arg3[%c0_1, %c0_2, %c0_3] : memref<1x16x16xf32, #tpu.memory_space<vmem>>, vector<1x16x16xf32>
    %3 = vector.shape_cast %2 : vector<1x16x16xf32> to vector<16x16xf32>
    %4 = arith.truncf %3 : vector<16x16xf32> to vector<16x16xbf16>
    %c0_4 = arith.constant 0 : index
    %c0_5 = arith.constant 0 : index
    %5 = vector.load %arg6[%c0_4, %c0_5] : memref<8x16xbf16, #tpu.memory_space<vmem>>, vector<8x16xbf16>
    %cst = arith.constant dense<0.000000e+00> : vector<8x16xf32>
    %6 = tpu.matmul %5, %4, %cst {dimension_numbers = #tpu.dot_dimension_numbers<[1], [0], [0], [1], [0, 0, 1, 1], [], []>} : vector<8x16xbf16>, vector<16x16xbf16>, vector<8x16xf32> -> vector<8x16xf32>
    %7 = vector.extract_strided_slice %1 {offsets = [0, 0], sizes = [8, 1], strides = [1, 1]} : vector<8x2xf32> to vector<8x1xf32>
    %8 = vector.broadcast %7 : vector<8x1xf32> to vector<8x16xf32>
    %9 = arith.addf %6, %8 : vector<8x16xf32>
    %cst_6 = arith.constant 0.000000e+00 : f32
    %10 = vector.broadcast %cst_6 : f32 to vector<8x16xf32>
    %11 = arith.maximumf %9, %10 : vector<8x16xf32>
    %cst_7 = arith.constant 0.000000e+00 : f32
    %12 = vector.broadcast %cst_7 : f32 to vector<8x256xf32>
    %c0_8 = arith.constant 0 : index
    %c0_9 = arith.constant 0 : index
    %13 = vector.load %arg12[%c0_8, %c0_9] : memref<8x256xf32, #tpu.memory_space<vmem>>, vector<8x256xf32>
    tpu.vector_store %arg12[%c0_8, %c0_9], %12 {strides = array<i32>} : memref<8x256xf32, #tpu.memory_space<vmem>>, vector<8x256xf32>,
    %c0_10 = arith.constant 0 : index
    %c0_11 = arith.constant 0 : index
    %14 = vector.load %arg12[%c0_10, %c0_11] : memref<8x256xf32, #tpu.memory_space<vmem>>, vector<8x16xf32>
    tpu.vector_store %arg12[%c0_10, %c0_11], %11 {strides = array<i32>} : memref<8x256xf32, #tpu.memory_space<vmem>>, vector<8x16xf32>,
    %c0_12 = arith.constant 0 : index
    %c0_13 = arith.constant 0 : index
    %15 = vector.load %arg12[%c0_12, %c0_13] : memref<8x256xf32, #tpu.memory_space<vmem>>, vector<8x128xf32>
    %16 = tpu.iota {dimensions = array<i32: 1>} : vector<8x128xi32>
    %c2_i32 = arith.constant 2 : i32
    %17 = vector.broadcast %c2_i32 : i32 to vector<8x128xi32>
    %18 = arith.shrsi %16, %17 : vector<8x128xi32>
    %c3_i32 = arith.constant 3 : i32
    %19 = vector.broadcast %c3_i32 : i32 to vector<8x128xi32>
    %20 = arith.andi %16, %19 : vector<8x128xi32>
    %c5_i32 = arith.constant 5 : i32
    %21 = tpu.dynamic_rotate %15 by %c5_i32 dim 1 : vector<8x128xf32>, i32 -> vector<8x128xf32>
    %c-1_i32 = arith.constant -1 : i32
    %22 = vector.broadcast %c-1_i32 : i32 to vector<8x128xi32>
    %23 = arith.addi %18, %22 : vector<8x128xi32>
    %c0_i32 = arith.constant 0 : i32
    %24 = vector.broadcast %c0_i32 : i32 to vector<8x128xi32>
    %25 = arith.cmpi sge, %23, %24 : vector<8x128xi32>
    %c-1_i32_14 = arith.constant -1 : i32
    %26 = vector.broadcast %c-1_i32_14 : i32 to vector<8x128xi32>
    %27 = arith.addi %18, %26 : vector<8x128xi32>
    %c4_i32 = arith.constant 4 : i32
    %28 = vector.broadcast %c4_i32 : i32 to vector<8x128xi32>
    %29 = arith.cmpi slt, %27, %28 : vector<8x128xi32>
    %30 = arith.andi %25, %29 : vector<8x128xi1>
    %c-1_i32_15 = arith.constant -1 : i32
    %31 = vector.broadcast %c-1_i32_15 : i32 to vector<8x128xi32>
    %32 = arith.addi %20, %31 : vector<8x128xi32>
    %c0_i32_16 = arith.constant 0 : i32
    %33 = vector.broadcast %c0_i32_16 : i32 to vector<8x128xi32>
    %34 = arith.cmpi sge, %32, %33 : vector<8x128xi32>
    %35 = arith.andi %30, %34 : vector<8x128xi1>
    %c-1_i32_17 = arith.constant -1 : i32
    %36 = vector.broadcast %c-1_i32_17 : i32 to vector<8x128xi32>
    %37 = arith.addi %20, %36 : vector<8x128xi32>
    %c4_i32_18 = arith.constant 4 : i32
    %38 = vector.broadcast %c4_i32_18 : i32 to vector<8x128xi32>
    %39 = arith.cmpi slt, %37, %38 : vector<8x128xi32>
    %40 = arith.andi %35, %39 : vector<8x128xi1>
    %cst_19 = arith.constant 0.000000e+00 : f32
    %41 = vector.broadcast %cst_19 : f32 to vector<8x128xf32>
    %42 = arith.select %40, %21, %41 : vector<8x128xi1>, vector<8x128xf32>
    %c4_i32_20 = arith.constant 4 : i32
    %43 = tpu.dynamic_rotate %15 by %c4_i32_20 dim 1 : vector<8x128xf32>, i32 -> vector<8x128xf32>
    %c-1_i32_21 = arith.constant -1 : i32
    %44 = vector.broadcast %c-1_i32_21 : i32 to vector<8x128xi32>
    %45 = arith.addi %18, %44 : vector<8x128xi32>
    %c0_i32_22 = arith.constant 0 : i32
    %46 = vector.broadcast %c0_i32_22 : i32 to vector<8x128xi32>
    %47 = arith.cmpi sge, %45, %46 : vector<8x128xi32>
    %c-1_i32_23 = arith.constant -1 : i32
    %48 = vector.broadcast %c-1_i32_23 : i32 to vector<8x128xi32>
    %49 = arith.addi %18, %48 : vector<8x128xi32>
    %c4_i32_24 = arith.constant 4 : i32
    %50 = vector.broadcast %c4_i32_24 : i32 to vector<8x128xi32>
    %51 = arith.cmpi slt, %49, %50 : vector<8x128xi32>
    %52 = arith.andi %47, %51 : vector<8x128xi1>
    %c0_i32_25 = arith.constant 0 : i32
    %53 = vector.broadcast %c0_i32_25 : i32 to vector<8x128xi32>
    %54 = arith.addi %20, %53 : vector<8x128xi32>
    %c0_i32_26 = arith.constant 0 : i32
    %55 = vector.broadcast %c0_i32_26 : i32 to vector<8x128xi32>
    %56 = arith.cmpi sge, %54, %55 : vector<8x128xi32>
    %57 = arith.andi %52, %56 : vector<8x128xi1>
    %c0_i32_27 = arith.constant 0 : i32
    %58 = vector.broadcast %c0_i32_27 : i32 to vector<8x128xi32>
    %59 = arith.addi %20, %58 : vector<8x128xi32>
    %c4_i32_28 = arith.constant 4 : i32
    %60 = vector.broadcast %c4_i32_28 : i32 to vector<8x128xi32>
    %61 = arith.cmpi slt, %59, %60 : vector<8x128xi32>
    %62 = arith.andi %57, %61 : vector<8x128xi1>
    %cst_29 = arith.constant 0.000000e+00 : f32
    %63 = vector.broadcast %cst_29 : f32 to vector<8x128xf32>
    %64 = arith.select %62, %43, %63 : vector<8x128xi1>, vector<8x128xf32>
    %c3_i32_30 = arith.constant 3 : i32
    %65 = tpu.dynamic_rotate %15 by %c3_i32_30 dim 1 : vector<8x128xf32>, i32 -> vector<8x128xf32>
    %c-1_i32_31 = arith.constant -1 : i32
    %66 = vector.broadcast %c-1_i32_31 : i32 to vector<8x128xi32>
    %67 = arith.addi %18, %66 : vector<8x128xi32>
    %c0_i32_32 = arith.constant 0 : i32
    %68 = vector.broadcast %c0_i32_32 : i32 to vector<8x128xi32>
    %69 = arith.cmpi sge, %67, %68 : vector<8x128xi32>
    %c-1_i32_33 = arith.constant -1 : i32
    %70 = vector.broadcast %c-1_i32_33 : i32 to vector<8x128xi32>
    %71 = arith.addi %18, %70 : vector<8x128xi32>
    %c4_i32_34 = arith.constant 4 : i32
    %72 = vector.broadcast %c4_i32_34 : i32 to vector<8x128xi32>
    %73 = arith.cmpi slt, %71, %72 : vector<8x128xi32>
    %74 = arith.andi %69, %73 : vector<8x128xi1>
    %c1_i32 = arith.constant 1 : i32
    %75 = vector.broadcast %c1_i32 : i32 to vector<8x128xi32>
    %76 = arith.addi %20, %75 : vector<8x128xi32>
    %c0_i32_35 = arith.constant 0 : i32
    %77 = vector.broadcast %c0_i32_35 : i32 to vector<8x128xi32>
    %78 = arith.cmpi sge, %76, %77 : vector<8x128xi32>
    %79 = arith.andi %74, %78 : vector<8x128xi1>
    %c1_i32_36 = arith.constant 1 : i32
    %80 = vector.broadcast %c1_i32_36 : i32 to vector<8x128xi32>
    %81 = arith.addi %20, %80 : vector<8x128xi32>
    %c4_i32_37 = arith.constant 4 : i32
    %82 = vector.broadcast %c4_i32_37 : i32 to vector<8x128xi32>
    %83 = arith.cmpi slt, %81, %82 : vector<8x128xi32>
    %84 = arith.andi %79, %83 : vector<8x128xi1>
    %cst_38 = arith.constant 0.000000e+00 : f32
    %85 = vector.broadcast %cst_38 : f32 to vector<8x128xf32>
    %86 = arith.select %84, %65, %85 : vector<8x128xi1>, vector<8x128xf32>
    %c1_i32_39 = arith.constant 1 : i32
    %87 = tpu.dynamic_rotate %15 by %c1_i32_39 dim 1 : vector<8x128xf32>, i32 -> vector<8x128xf32>
    %c0_i32_40 = arith.constant 0 : i32
    %88 = vector.broadcast %c0_i32_40 : i32 to vector<8x128xi32>
    %89 = arith.addi %18, %88 : vector<8x128xi32>
    %c0_i32_41 = arith.constant 0 : i32
    %90 = vector.broadcast %c0_i32_41 : i32 to vector<8x128xi32>
    %91 = arith.cmpi sge, %89, %90 : vector<8x128xi32>
    %c0_i32_42 = arith.constant 0 : i32
    %92 = vector.broadcast %c0_i32_42 : i32 to vector<8x128xi32>
    %93 = arith.addi %18, %92 : vector<8x128xi32>
    %c4_i32_43 = arith.constant 4 : i32
    %94 = vector.broadcast %c4_i32_43 : i32 to vector<8x128xi32>
    %95 = arith.cmpi slt, %93, %94 : vector<8x128xi32>
    %96 = arith.andi %91, %95 : vector<8x128xi1>
    %c-1_i32_44 = arith.constant -1 : i32
    %97 = vector.broadcast %c-1_i32_44 : i32 to vector<8x128xi32>
    %98 = arith.addi %20, %97 : vector<8x128xi32>
    %c0_i32_45 = arith.constant 0 : i32
    %99 = vector.broadcast %c0_i32_45 : i32 to vector<8x128xi32>
    %100 = arith.cmpi sge, %98, %99 : vector<8x128xi32>
    %101 = arith.andi %96, %100 : vector<8x128xi1>
    %c-1_i32_46 = arith.constant -1 : i32
    %102 = vector.broadcast %c-1_i32_46 : i32 to vector<8x128xi32>
    %103 = arith.addi %20, %102 : vector<8x128xi32>
    %c4_i32_47 = arith.constant 4 : i32
    %104 = vector.broadcast %c4_i32_47 : i32 to vector<8x128xi32>
    %105 = arith.cmpi slt, %103, %104 : vector<8x128xi32>
    %106 = arith.andi %101, %105 : vector<8x128xi1>
    %cst_48 = arith.constant 0.000000e+00 : f32
    %107 = vector.broadcast %cst_48 : f32 to vector<8x128xf32>
    %108 = arith.select %106, %87, %107 : vector<8x128xi1>, vector<8x128xf32>
    %c0_i32_49 = arith.constant 0 : i32
    %109 = vector.broadcast %c0_i32_49 : i32 to vector<8x128xi32>
    %110 = arith.addi %18, %109 : vector<8x128xi32>
    %c0_i32_50 = arith.constant 0 : i32
    %111 = vector.broadcast %c0_i32_50 : i32 to vector<8x128xi32>
    %112 = arith.cmpi sge, %110, %111 : vector<8x128xi32>
    %c0_i32_51 = arith.constant 0 : i32
    %113 = vector.broadcast %c0_i32_51 : i32 to vector<8x128xi32>
    %114 = arith.addi %18, %113 : vector<8x128xi32>
    %c4_i32_52 = arith.constant 4 : i32
    %115 = vector.broadcast %c4_i32_52 : i32 to vector<8x128xi32>
    %116 = arith.cmpi slt, %114, %115 : vector<8x128xi32>
    %117 = arith.andi %112, %116 : vector<8x128xi1>
    %c0_i32_53 = arith.constant 0 : i32
    %118 = vector.broadcast %c0_i32_53 : i32 to vector<8x128xi32>
    %119 = arith.addi %20, %118 : vector<8x128xi32>
    %c0_i32_54 = arith.constant 0 : i32
    %120 = vector.broadcast %c0_i32_54 : i32 to vector<8x128xi32>
    %121 = arith.cmpi sge, %119, %120 : vector<8x128xi32>
    %122 = arith.andi %117, %121 : vector<8x128xi1>
    %c0_i32_55 = arith.constant 0 : i32
    %123 = vector.broadcast %c0_i32_55 : i32 to vector<8x128xi32>
    %124 = arith.addi %20, %123 : vector<8x128xi32>
    %c4_i32_56 = arith.constant 4 : i32
    %125 = vector.broadcast %c4_i32_56 : i32 to vector<8x128xi32>
    %126 = arith.cmpi slt, %124, %125 : vector<8x128xi32>
    %127 = arith.andi %122, %126 : vector<8x128xi1>
    %cst_57 = arith.constant 0.000000e+00 : f32
    %128 = vector.broadcast %cst_57 : f32 to vector<8x128xf32>
    %129 = arith.select %127, %15, %128 : vector<8x128xi1>, vector<8x128xf32>
    %c127_i32 = arith.constant 127 : i32
    %130 = tpu.dynamic_rotate %15 by %c127_i32 dim 1 : vector<8x128xf32>, i32 -> vector<8x128xf32>
    %c0_i32_58 = arith.constant 0 : i32
    %131 = vector.broadcast %c0_i32_58 : i32 to vector<8x128xi32>
    %132 = arith.addi %18, %131 : vector<8x128xi32>
    %c0_i32_59 = arith.constant 0 : i32
    %133 = vector.broadcast %c0_i32_59 : i32 to vector<8x128xi32>
    %134 = arith.cmpi sge, %132, %133 : vector<8x128xi32>
    %c0_i32_60 = arith.constant 0 : i32
    %135 = vector.broadcast %c0_i32_60 : i32 to vector<8x128xi32>
    %136 = arith.addi %18, %135 : vector<8x128xi32>
    %c4_i32_61 = arith.constant 4 : i32
    %137 = vector.broadcast %c4_i32_61 : i32 to vector<8x128xi32>
    %138 = arith.cmpi slt, %136, %137 : vector<8x128xi32>
    %139 = arith.andi %134, %138 : vector<8x128xi1>
    %c1_i32_62 = arith.constant 1 : i32
    %140 = vector.broadcast %c1_i32_62 : i32 to vector<8x128xi32>
    %141 = arith.addi %20, %140 : vector<8x128xi32>
    %c0_i32_63 = arith.constant 0 : i32
    %142 = vector.broadcast %c0_i32_63 : i32 to vector<8x128xi32>
    %143 = arith.cmpi sge, %141, %142 : vector<8x128xi32>
    %144 = arith.andi %139, %143 : vector<8x128xi1>
    %c1_i32_64 = arith.constant 1 : i32
    %145 = vector.broadcast %c1_i32_64 : i32 to vector<8x128xi32>
    %146 = arith.addi %20, %145 : vector<8x128xi32>
    %c4_i32_65 = arith.constant 4 : i32
    %147 = vector.broadcast %c4_i32_65 : i32 to vector<8x128xi32>
    %148 = arith.cmpi slt, %146, %147 : vector<8x128xi32>
    %149 = arith.andi %144, %148 : vector<8x128xi1>
    %cst_66 = arith.constant 0.000000e+00 : f32
    %150 = vector.broadcast %cst_66 : f32 to vector<8x128xf32>
    %151 = arith.select %149, %130, %150 : vector<8x128xi1>, vector<8x128xf32>
    %c125_i32 = arith.constant 125 : i32
    %152 = tpu.dynamic_rotate %15 by %c125_i32 dim 1 : vector<8x128xf32>, i32 -> vector<8x128xf32>
    %c1_i32_67 = arith.constant 1 : i32
    %153 = vector.broadcast %c1_i32_67 : i32 to vector<8x128xi32>
    %154 = arith.addi %18, %153 : vector<8x128xi32>
    %c0_i32_68 = arith.constant 0 : i32
    %155 = vector.broadcast %c0_i32_68 : i32 to vector<8x128xi32>
    %156 = arith.cmpi sge, %154, %155 : vector<8x128xi32>
    %c1_i32_69 = arith.constant 1 : i32
    %157 = vector.broadcast %c1_i32_69 : i32 to vector<8x128xi32>
    %158 = arith.addi %18, %157 : vector<8x128xi32>
    %c4_i32_70 = arith.constant 4 : i32
    %159 = vector.broadcast %c4_i32_70 : i32 to vector<8x128xi32>
    %160 = arith.cmpi slt, %158, %159 : vector<8x128xi32>
    %161 = arith.andi %156, %160 : vector<8x128xi1>
    %c-1_i32_71 = arith.constant -1 : i32
    %162 = vector.broadcast %c-1_i32_71 : i32 to vector<8x128xi32>
    %163 = arith.addi %20, %162 : vector<8x128xi32>
    %c0_i32_72 = arith.constant 0 : i32
    %164 = vector.broadcast %c0_i32_72 : i32 to vector<8x128xi32>
    %165 = arith.cmpi sge, %163, %164 : vector<8x128xi32>
    %166 = arith.andi %161, %165 : vector<8x128xi1>
    %c-1_i32_73 = arith.constant -1 : i32
    %167 = vector.broadcast %c-1_i32_73 : i32 to vector<8x128xi32>
    %168 = arith.addi %20, %167 : vector<8x128xi32>
    %c4_i32_74 = arith.constant 4 : i32
    %169 = vector.broadcast %c4_i32_74 : i32 to vector<8x128xi32>
    %170 = arith.cmpi slt, %168, %169 : vector<8x128xi32>
    %171 = arith.andi %166, %170 : vector<8x128xi1>
    %cst_75 = arith.constant 0.000000e+00 : f32
    %172 = vector.broadcast %cst_75 : f32 to vector<8x128xf32>
    %173 = arith.select %171, %152, %172 : vector<8x128xi1>, vector<8x128xf32>
    %c124_i32 = arith.constant 124 : i32
    %174 = tpu.dynamic_rotate %15 by %c124_i32 dim 1 : vector<8x128xf32>, i32 -> vector<8x128xf32>
    %c1_i32_76 = arith.constant 1 : i32
    %175 = vector.broadcast %c1_i32_76 : i32 to vector<8x128xi32>
    %176 = arith.addi %18, %175 : vector<8x128xi32>
    %c0_i32_77 = arith.constant 0 : i32
    %177 = vector.broadcast %c0_i32_77 : i32 to vector<8x128xi32>
    %178 = arith.cmpi sge, %176, %177 : vector<8x128xi32>
    %c1_i32_78 = arith.constant 1 : i32
    %179 = vector.broadcast %c1_i32_78 : i32 to vector<8x128xi32>
    %180 = arith.addi %18, %179 : vector<8x128xi32>
    %c4_i32_79 = arith.constant 4 : i32
    %181 = vector.broadcast %c4_i32_79 : i32 to vector<8x128xi32>
    %182 = arith.cmpi slt, %180, %181 : vector<8x128xi32>
    %183 = arith.andi %178, %182 : vector<8x128xi1>
    %c0_i32_80 = arith.constant 0 : i32
    %184 = vector.broadcast %c0_i32_80 : i32 to vector<8x128xi32>
    %185 = arith.addi %20, %184 : vector<8x128xi32>
    %c0_i32_81 = arith.constant 0 : i32
    %186 = vector.broadcast %c0_i32_81 : i32 to vector<8x128xi32>
    %187 = arith.cmpi sge, %185, %186 : vector<8x128xi32>
    %188 = arith.andi %183, %187 : vector<8x128xi1>
    %c0_i32_82 = arith.constant 0 : i32
    %189 = vector.broadcast %c0_i32_82 : i32 to vector<8x128xi32>
    %190 = arith.addi %20, %189 : vector<8x128xi32>
    %c4_i32_83 = arith.constant 4 : i32
    %191 = vector.broadcast %c4_i32_83 : i32 to vector<8x128xi32>
    %192 = arith.cmpi slt, %190, %191 : vector<8x128xi32>
    %193 = arith.andi %188, %192 : vector<8x128xi1>
    %cst_84 = arith.constant 0.000000e+00 : f32
    %194 = vector.broadcast %cst_84 : f32 to vector<8x128xf32>
    %195 = arith.select %193, %174, %194 : vector<8x128xi1>, vector<8x128xf32>
    %c123_i32 = arith.constant 123 : i32
    %196 = tpu.dynamic_rotate %15 by %c123_i32 dim 1 : vector<8x128xf32>, i32 -> vector<8x128xf32>
    %c1_i32_85 = arith.constant 1 : i32
    %197 = vector.broadcast %c1_i32_85 : i32 to vector<8x128xi32>
    %198 = arith.addi %18, %197 : vector<8x128xi32>
    %c0_i32_86 = arith.constant 0 : i32
    %199 = vector.broadcast %c0_i32_86 : i32 to vector<8x128xi32>
    %200 = arith.cmpi sge, %198, %199 : vector<8x128xi32>
    %c1_i32_87 = arith.constant 1 : i32
    %201 = vector.broadcast %c1_i32_87 : i32 to vector<8x128xi32>
    %202 = arith.addi %18, %201 : vector<8x128xi32>
    %c4_i32_88 = arith.constant 4 : i32
    %203 = vector.broadcast %c4_i32_88 : i32 to vector<8x128xi32>
    %204 = arith.cmpi slt, %202, %203 : vector<8x128xi32>
    %205 = arith.andi %200, %204 : vector<8x128xi1>
    %c1_i32_89 = arith.constant 1 : i32
    %206 = vector.broadcast %c1_i32_89 : i32 to vector<8x128xi32>
    %207 = arith.addi %20, %206 : vector<8x128xi32>
    %c0_i32_90 = arith.constant 0 : i32
    %208 = vector.broadcast %c0_i32_90 : i32 to vector<8x128xi32>
    %209 = arith.cmpi sge, %207, %208 : vector<8x128xi32>
    %210 = arith.andi %205, %209 : vector<8x128xi1>
    %c1_i32_91 = arith.constant 1 : i32
    %211 = vector.broadcast %c1_i32_91 : i32 to vector<8x128xi32>
    %212 = arith.addi %20, %211 : vector<8x128xi32>
    %c4_i32_92 = arith.constant 4 : i32
    %213 = vector.broadcast %c4_i32_92 : i32 to vector<8x128xi32>
    %214 = arith.cmpi slt, %212, %213 : vector<8x128xi32>
    %215 = arith.andi %210, %214 : vector<8x128xi1>
    %cst_93 = arith.constant 0.000000e+00 : f32
    %216 = vector.broadcast %cst_93 : f32 to vector<8x128xf32>
    %217 = arith.select %215, %196, %216 : vector<8x128xi1>, vector<8x128xf32>
    %218 = tpu.concatenate %42, %64, %86, %108, %129, %151, %173, %195, %217 in 0 : vector<8x128xf32>, vector<8x128xf32>, vector<8x128xf32>, vector<8x128xf32>, vector<8x128xf32>, vector<8x128xf32>, vector<8x128xf32>, vector<8x128xf32>, vector<8x128xf32> -> vector<72x128xf32>
    %219 = arith.truncf %218 : vector<72x128xf32> to vector<72x128xbf16>
    %c2_94 = arith.constant 2 : index
    %c0_95 = arith.constant 0 : index
    %c0_96 = arith.constant 0 : index
    %220 = vector.load %arg7[%c2_94, %c0_95, %c0_96] : memref<3x8x72xbf16, #tpu.memory_space<vmem>>, vector<1x8x72xbf16>
    %221 = vector.shape_cast %220 : vector<1x8x72xbf16> to vector<8x72xbf16>
    %cst_97 = arith.constant dense<0.000000e+00> : vector<8x128xf32>
    %222 = tpu.matmul %221, %219, %cst_97 {dimension_numbers = #tpu.dot_dimension_numbers<[1], [0], [0], [1], [0, 0, 1, 1], [], []>} : vector<8x72xbf16>, vector<72x128xbf16>, vector<8x128xf32> -> vector<8x128xf32>
    %223 = vector.extract_strided_slice %1 {offsets = [0, 1], sizes = [8, 1], strides = [1, 1]} : vector<8x2xf32> to vector<8x1xf32>
    %224 = vector.broadcast %223 : vector<8x1xf32> to vector<8x128xf32>
    %225 = arith.addf %222, %224 : vector<8x128xf32>
    %cst_98 = arith.constant 0.000000e+00 : f32
    %226 = vector.broadcast %cst_98 : f32 to vector<8x128xf32>
    %227 = arith.maximumf %225, %226 : vector<8x128xf32>
    %228 = vector.extract_strided_slice %227 {offsets = [0, 0], sizes = [8, 16], strides = [1, 1]} : vector<8x128xf32> to vector<8x16xf32>
    %c0_99 = arith.constant 0 : index
    %c0_100 = arith.constant 0 : index
    %c0_101 = arith.constant 0 : index
    %229 = vector.load %arg11[%c0_99, %c0_100, %c0_101] : memref<1x8x16xf32, #tpu.memory_space<vmem>>, vector<1x8x16xf32>
    %230 = vector.shape_cast %229 : vector<1x8x16xf32> to vector<8x16xf32>
    %231 = vector.shape_cast %228 : vector<8x16xf32> to vector<1x8x16xf32>
    tpu.vector_store %arg11[%c0_99, %c0_100, %c0_101], %231 {strides = array<i32>} : memref<1x8x16xf32, #tpu.memory_space<vmem>>, vector<1x8x16xf32>,
    %c1 = arith.constant 1 : index
    %c0_102 = arith.constant 0 : index
    %c0_103 = arith.constant 0 : index
    %232 = vector.load %arg8[%c1, %c0_102, %c0_103] : memref<3x8x2xf32, #tpu.memory_space<vmem>>, vector<1x8x2xf32>
    %233 = vector.shape_cast %232 : vector<1x8x2xf32> to vector<8x2xf32>
    %c0_104 = arith.constant 0 : index
    %c0_105 = arith.constant 0 : index
    %c0_106 = arith.constant 0 : index
    %234 = vector.load %arg2[%c0_104, %c0_105, %c0_106] : memref<1x8x64xf32, #tpu.memory_space<vmem>>, vector<1x8x64xf32>
    %235 = vector.shape_cast %234 : vector<1x8x64xf32> to vector<8x64xf32>
    %236 = arith.truncf %235 : vector<8x64xf32> to vector<8x64xbf16>
    %c0_107 = arith.constant 0 : index
    %c0_108 = arith.constant 0 : index
    %237 = vector.load %arg5[%c0_107, %c0_108] : memref<8x8xbf16, #tpu.memory_space<vmem>>, vector<8x8xbf16>
    %cst_109 = arith.constant dense<0.000000e+00> : vector<8x64xf32>
    %238 = tpu.matmul %237, %236, %cst_109 {dimension_numbers = #tpu.dot_dimension_numbers<[1], [0], [0], [1], [0, 0, 1, 1], [], []>} : vector<8x8xbf16>, vector<8x64xbf16>, vector<8x64xf32> -> vector<8x64xf32>
    %239 = vector.extract_strided_slice %233 {offsets = [0, 0], sizes = [8, 1], strides = [1, 1]} : vector<8x2xf32> to vector<8x1xf32>
    %240 = vector.broadcast %239 : vector<8x1xf32> to vector<8x64xf32>
    %241 = arith.addf %238, %240 : vector<8x64xf32>
    %cst_110 = arith.constant 0.000000e+00 : f32
    %242 = vector.broadcast %cst_110 : f32 to vector<8x64xf32>
    %243 = arith.maximumf %241, %242 : vector<8x64xf32>
    %cst_111 = arith.constant 0.000000e+00 : f32
    %244 = vector.broadcast %cst_111 : f32 to vector<8x256xf32>
    %c0_112 = arith.constant 0 : index
    %c0_113 = arith.constant 0 : index
    %245 = vector.load %arg12[%c0_112, %c0_113] : memref<8x256xf32, #tpu.memory_space<vmem>>, vector<8x256xf32>
    tpu.vector_store %arg12[%c0_112, %c0_113], %244 {strides = array<i32>} : memref<8x256xf32, #tpu.memory_space<vmem>>, vector<8x256xf32>,
    %c0_114 = arith.constant 0 : index
    %c0_115 = arith.constant 0 : index
    %246 = vector.load %arg12[%c0_114, %c0_115] : memref<8x256xf32, #tpu.memory_space<vmem>>, vector<8x64xf32>
    tpu.vector_store %arg12[%c0_114, %c0_115], %243 {strides = array<i32>} : memref<8x256xf32, #tpu.memory_space<vmem>>, vector<8x64xf32>,
    %c0_116 = arith.constant 0 : index
    %c0_117 = arith.constant 0 : index
    %247 = vector.load %arg12[%c0_116, %c0_117] : memref<8x256xf32, #tpu.memory_space<vmem>>, vector<8x128xf32>
    %248 = vector.extract_strided_slice %15 {offsets = [0, 0], sizes = [8, 4], strides = [1, 1]} : vector<8x128xf32> to vector<8x4xf32>
    %c124_i32_118 = arith.constant 124 : i32
    %249 = tpu.dynamic_rotate %15 by %c124_i32_118 dim 1 : vector<8x128xf32>, i32 -> vector<8x128xf32>
    %250 = vector.extract_strided_slice %249 {offsets = [0, 0], sizes = [8, 4], strides = [1, 1]} : vector<8x128xf32> to vector<8x4xf32>
    %c120_i32 = arith.constant 120 : i32
    %251 = tpu.dynamic_rotate %15 by %c120_i32 dim 1 : vector<8x128xf32>, i32 -> vector<8x128xf32>
    %252 = vector.extract_strided_slice %251 {offsets = [0, 0], sizes = [8, 4], strides = [1, 1]} : vector<8x128xf32> to vector<8x4xf32>
    %c116_i32 = arith.constant 116 : i32
    %253 = tpu.dynamic_rotate %15 by %c116_i32 dim 1 : vector<8x128xf32>, i32 -> vector<8x128xf32>
    %254 = vector.extract_strided_slice %253 {offsets = [0, 0], sizes = [8, 4], strides = [1, 1]} : vector<8x128xf32> to vector<8x4xf32>
    %255 = tpu.concatenate %248, %250, %252, %254 in 0 : vector<8x4xf32>, vector<8x4xf32>, vector<8x4xf32>, vector<8x4xf32> -> vector<32x4xf32>
    %256 = arith.truncf %255 : vector<32x4xf32> to vector<32x4xbf16>
    %257 = tpu.iota {dimensions = array<i32: 0>} : vector<4x128xi32>
    %258 = tpu.iota {dimensions = array<i32: 1>} : vector<4x128xi32>
    %c1_i32_119 = arith.constant 1 : i32
    %259 = vector.broadcast %c1_i32_119 : i32 to vector<4x128xi32>
    %260 = arith.shrsi %258, %259 : vector<4x128xi32>
    %c8_i32 = arith.constant 8 : i32
    %261 = vector.broadcast %c8_i32 : i32 to vector<4x128xi32>
    %262 = arith.cmpi slt, %258, %261 : vector<4x128xi32>
    %263 = arith.cmpi eq, %260, %257 : vector<4x128xi32>
    %264 = arith.andi %262, %263 : vector<4x128xi1>
    %265 = arith.extui %264 : vector<4x128xi1> to vector<4x128xi32>
    %266 = arith.sitofp %265 : vector<4x128xi32> to vector<4x128xf32>
    %267 = arith.truncf %266 : vector<4x128xf32> to vector<4x128xbf16>
    %cst_120 = arith.constant dense<0.000000e+00> : vector<32x128xf32>
    %268 = tpu.matmul %256, %267, %cst_120 {dimension_numbers = #tpu.dot_dimension_numbers<[1], [0], [0], [1], [0, 0, 1, 1], [], []>} : vector<32x4xbf16>, vector<4x128xbf16>, vector<32x128xf32> -> vector<32x128xf32>
    %cst_121 = arith.constant 0.000000e+00 : f32
    %269 = vector.broadcast %cst_121 : f32 to vector<8x128xf32>
    %270 = vector.extract_strided_slice %268 {offsets = [0, 0], sizes = [8, 128], strides = [1, 1]} : vector<32x128xf32> to vector<8x128xf32>
    %271 = arith.addf %269, %270 : vector<8x128xf32>
    %272 = vector.extract_strided_slice %268 {offsets = [0, 0], sizes = [8, 128], strides = [1, 1]} : vector<32x128xf32> to vector<8x128xf32>
    %c8_i32_122 = arith.constant 8 : i32
    %273 = tpu.dynamic_rotate %272 by %c8_i32_122 dim 1 : vector<8x128xf32>, i32 -> vector<8x128xf32>
    %274 = arith.addf %271, %273 : vector<8x128xf32>
    %275 = vector.extract_strided_slice %268 {offsets = [8, 0], sizes = [8, 128], strides = [1, 1]} : vector<32x128xf32> to vector<8x128xf32>
    %c16_i32 = arith.constant 16 : i32
    %276 = tpu.dynamic_rotate %275 by %c16_i32 dim 1 : vector<8x128xf32>, i32 -> vector<8x128xf32>
    %277 = arith.addf %274, %276 : vector<8x128xf32>
    %278 = vector.extract_strided_slice %268 {offsets = [8, 0], sizes = [8, 128], strides = [1, 1]} : vector<32x128xf32> to vector<8x128xf32>
    %c24_i32 = arith.constant 24 : i32
    %279 = tpu.dynamic_rotate %278 by %c24_i32 dim 1 : vector<8x128xf32>, i32 -> vector<8x128xf32>
    %280 = arith.addf %277, %279 : vector<8x128xf32>
    %281 = vector.extract_strided_slice %268 {offsets = [16, 0], sizes = [8, 128], strides = [1, 1]} : vector<32x128xf32> to vector<8x128xf32>
    %c32_i32 = arith.constant 32 : i32
    %282 = tpu.dynamic_rotate %281 by %c32_i32 dim 1 : vector<8x128xf32>, i32 -> vector<8x128xf32>
    %283 = arith.addf %280, %282 : vector<8x128xf32>
    %284 = vector.extract_strided_slice %268 {offsets = [16, 0], sizes = [8, 128], strides = [1, 1]} : vector<32x128xf32> to vector<8x128xf32>
    %c40_i32 = arith.constant 40 : i32
    %285 = tpu.dynamic_rotate %284 by %c40_i32 dim 1 : vector<8x128xf32>, i32 -> vector<8x128xf32>
    %286 = arith.addf %283, %285 : vector<8x128xf32>
    %287 = vector.extract_strided_slice %268 {offsets = [24, 0], sizes = [8, 128], strides = [1, 1]} : vector<32x128xf32> to vector<8x128xf32>
    %c48_i32 = arith.constant 48 : i32
    %288 = tpu.dynamic_rotate %287 by %c48_i32 dim 1 : vector<8x128xf32>, i32 -> vector<8x128xf32>
    %289 = arith.addf %286, %288 : vector<8x128xf32>
    %290 = vector.extract_strided_slice %268 {offsets = [24, 0], sizes = [8, 128], strides = [1, 1]} : vector<32x128xf32> to vector<8x128xf32>
    %c56_i32 = arith.constant 56 : i32
    %291 = tpu.dynamic_rotate %290 by %c56_i32 dim 1 : vector<8x128xf32>, i32 -> vector<8x128xf32>
    %292 = arith.addf %289, %291 : vector<8x128xf32>
    %293 = arith.addf %247, %292 : vector<8x128xf32>
    %294 = tpu.iota {dimensions = array<i32: 1>} : vector<8x128xi32>
    %c3_i32_123 = arith.constant 3 : i32
    %295 = vector.broadcast %c3_i32_123 : i32 to vector<8x128xi32>
    %296 = arith.shrsi %294, %295 : vector<8x128xi32>
    %c7_i32 = arith.constant 7 : i32
    %297 = vector.broadcast %c7_i32 : i32 to vector<8x128xi32>
    %298 = arith.andi %294, %297 : vector<8x128xi32>
    %c9_i32 = arith.constant 9 : i32
    %299 = tpu.dynamic_rotate %293 by %c9_i32 dim 1 : vector<8x128xf32>, i32 -> vector<8x128xf32>
    %c-1_i32_124 = arith.constant -1 : i32
    %300 = vector.broadcast %c-1_i32_124 : i32 to vector<8x128xi32>
    %301 = arith.addi %296, %300 : vector<8x128xi32>
    %c0_i32_125 = arith.constant 0 : i32
    %302 = vector.broadcast %c0_i32_125 : i32 to vector<8x128xi32>
    %303 = arith.cmpi sge, %301, %302 : vector<8x128xi32>
    %c-1_i32_126 = arith.constant -1 : i32
    %304 = vector.broadcast %c-1_i32_126 : i32 to vector<8x128xi32>
    %305 = arith.addi %296, %304 : vector<8x128xi32>
    %c8_i32_127 = arith.constant 8 : i32
    %306 = vector.broadcast %c8_i32_127 : i32 to vector<8x128xi32>
    %307 = arith.cmpi slt, %305, %306 : vector<8x128xi32>
    %308 = arith.andi %303, %307 : vector<8x128xi1>
    %c-1_i32_128 = arith.constant -1 : i32
    %309 = vector.broadcast %c-1_i32_128 : i32 to vector<8x128xi32>
    %310 = arith.addi %298, %309 : vector<8x128xi32>
    %c0_i32_129 = arith.constant 0 : i32
    %311 = vector.broadcast %c0_i32_129 : i32 to vector<8x128xi32>
    %312 = arith.cmpi sge, %310, %311 : vector<8x128xi32>
    %313 = arith.andi %308, %312 : vector<8x128xi1>
    %c-1_i32_130 = arith.constant -1 : i32
    %314 = vector.broadcast %c-1_i32_130 : i32 to vector<8x128xi32>
    %315 = arith.addi %298, %314 : vector<8x128xi32>
    %c8_i32_131 = arith.constant 8 : i32
    %316 = vector.broadcast %c8_i32_131 : i32 to vector<8x128xi32>
    %317 = arith.cmpi slt, %315, %316 : vector<8x128xi32>
    %318 = arith.andi %313, %317 : vector<8x128xi1>
    %cst_132 = arith.constant 0.000000e+00 : f32
    %319 = vector.broadcast %cst_132 : f32 to vector<8x128xf32>
    %320 = arith.select %318, %299, %319 : vector<8x128xi1>, vector<8x128xf32>
    %c8_i32_133 = arith.constant 8 : i32
    %321 = tpu.dynamic_rotate %293 by %c8_i32_133 dim 1 : vector<8x128xf32>, i32 -> vector<8x128xf32>
    %c-1_i32_134 = arith.constant -1 : i32
    %322 = vector.broadcast %c-1_i32_134 : i32 to vector<8x128xi32>
    %323 = arith.addi %296, %322 : vector<8x128xi32>
    %c0_i32_135 = arith.constant 0 : i32
    %324 = vector.broadcast %c0_i32_135 : i32 to vector<8x128xi32>
    %325 = arith.cmpi sge, %323, %324 : vector<8x128xi32>
    %c-1_i32_136 = arith.constant -1 : i32
    %326 = vector.broadcast %c-1_i32_136 : i32 to vector<8x128xi32>
    %327 = arith.addi %296, %326 : vector<8x128xi32>
    %c8_i32_137 = arith.constant 8 : i32
    %328 = vector.broadcast %c8_i32_137 : i32 to vector<8x128xi32>
    %329 = arith.cmpi slt, %327, %328 : vector<8x128xi32>
    %330 = arith.andi %325, %329 : vector<8x128xi1>
    %c0_i32_138 = arith.constant 0 : i32
    %331 = vector.broadcast %c0_i32_138 : i32 to vector<8x128xi32>
    %332 = arith.addi %298, %331 : vector<8x128xi32>
    %c0_i32_139 = arith.constant 0 : i32
    %333 = vector.broadcast %c0_i32_139 : i32 to vector<8x128xi32>
    %334 = arith.cmpi sge, %332, %333 : vector<8x128xi32>
    %335 = arith.andi %330, %334 : vector<8x128xi1>
    %c0_i32_140 = arith.constant 0 : i32
    %336 = vector.broadcast %c0_i32_140 : i32 to vector<8x128xi32>
    %337 = arith.addi %298, %336 : vector<8x128xi32>
    %c8_i32_141 = arith.constant 8 : i32
    %338 = vector.broadcast %c8_i32_141 : i32 to vector<8x128xi32>
    %339 = arith.cmpi slt, %337, %338 : vector<8x128xi32>
    %340 = arith.andi %335, %339 : vector<8x128xi1>
    %cst_142 = arith.constant 0.000000e+00 : f32
    %341 = vector.broadcast %cst_142 : f32 to vector<8x128xf32>
    %342 = arith.select %340, %321, %341 : vector<8x128xi1>, vector<8x128xf32>
    %c7_i32_143 = arith.constant 7 : i32
    %343 = tpu.dynamic_rotate %293 by %c7_i32_143 dim 1 : vector<8x128xf32>, i32 -> vector<8x128xf32>
    %c-1_i32_144 = arith.constant -1 : i32
    %344 = vector.broadcast %c-1_i32_144 : i32 to vector<8x128xi32>
    %345 = arith.addi %296, %344 : vector<8x128xi32>
    %c0_i32_145 = arith.constant 0 : i32
    %346 = vector.broadcast %c0_i32_145 : i32 to vector<8x128xi32>
    %347 = arith.cmpi sge, %345, %346 : vector<8x128xi32>
    %c-1_i32_146 = arith.constant -1 : i32
    %348 = vector.broadcast %c-1_i32_146 : i32 to vector<8x128xi32>
    %349 = arith.addi %296, %348 : vector<8x128xi32>
    %c8_i32_147 = arith.constant 8 : i32
    %350 = vector.broadcast %c8_i32_147 : i32 to vector<8x128xi32>
    %351 = arith.cmpi slt, %349, %350 : vector<8x128xi32>
    %352 = arith.andi %347, %351 : vector<8x128xi1>
    %c1_i32_148 = arith.constant 1 : i32
    %353 = vector.broadcast %c1_i32_148 : i32 to vector<8x128xi32>
    %354 = arith.addi %298, %353 : vector<8x128xi32>
    %c0_i32_149 = arith.constant 0 : i32
    %355 = vector.broadcast %c0_i32_149 : i32 to vector<8x128xi32>
    %356 = arith.cmpi sge, %354, %355 : vector<8x128xi32>
    %357 = arith.andi %352, %356 : vector<8x128xi1>
    %c1_i32_150 = arith.constant 1 : i32
    %358 = vector.broadcast %c1_i32_150 : i32 to vector<8x128xi32>
    %359 = arith.addi %298, %358 : vector<8x128xi32>
    %c8_i32_151 = arith.constant 8 : i32
    %360 = vector.broadcast %c8_i32_151 : i32 to vector<8x128xi32>
    %361 = arith.cmpi slt, %359, %360 : vector<8x128xi32>
    %362 = arith.andi %357, %361 : vector<8x128xi1>
    %cst_152 = arith.constant 0.000000e+00 : f32
    %363 = vector.broadcast %cst_152 : f32 to vector<8x128xf32>
    %364 = arith.select %362, %343, %363 : vector<8x128xi1>, vector<8x128xf32>
    %c1_i32_153 = arith.constant 1 : i32
    %365 = tpu.dynamic_rotate %293 by %c1_i32_153 dim 1 : vector<8x128xf32>, i32 -> vector<8x128xf32>
    %c0_i32_154 = arith.constant 0 : i32
    %366 = vector.broadcast %c0_i32_154 : i32 to vector<8x128xi32>
    %367 = arith.addi %296, %366 : vector<8x128xi32>
    %c0_i32_155 = arith.constant 0 : i32
    %368 = vector.broadcast %c0_i32_155 : i32 to vector<8x128xi32>
    %369 = arith.cmpi sge, %367, %368 : vector<8x128xi32>
    %c0_i32_156 = arith.constant 0 : i32
    %370 = vector.broadcast %c0_i32_156 : i32 to vector<8x128xi32>
    %371 = arith.addi %296, %370 : vector<8x128xi32>
    %c8_i32_157 = arith.constant 8 : i32
    %372 = vector.broadcast %c8_i32_157 : i32 to vector<8x128xi32>
    %373 = arith.cmpi slt, %371, %372 : vector<8x128xi32>
    %374 = arith.andi %369, %373 : vector<8x128xi1>
    %c-1_i32_158 = arith.constant -1 : i32
    %375 = vector.broadcast %c-1_i32_158 : i32 to vector<8x128xi32>
    %376 = arith.addi %298, %375 : vector<8x128xi32>
    %c0_i32_159 = arith.constant 0 : i32
    %377 = vector.broadcast %c0_i32_159 : i32 to vector<8x128xi32>
    %378 = arith.cmpi sge, %376, %377 : vector<8x128xi32>
    %379 = arith.andi %374, %378 : vector<8x128xi1>
    %c-1_i32_160 = arith.constant -1 : i32
    %380 = vector.broadcast %c-1_i32_160 : i32 to vector<8x128xi32>
    %381 = arith.addi %298, %380 : vector<8x128xi32>
    %c8_i32_161 = arith.constant 8 : i32
    %382 = vector.broadcast %c8_i32_161 : i32 to vector<8x128xi32>
    %383 = arith.cmpi slt, %381, %382 : vector<8x128xi32>
    %384 = arith.andi %379, %383 : vector<8x128xi1>
    %cst_162 = arith.constant 0.000000e+00 : f32
    %385 = vector.broadcast %cst_162 : f32 to vector<8x128xf32>
    %386 = arith.select %384, %365, %385 : vector<8x128xi1>, vector<8x128xf32>
    %c0_i32_163 = arith.constant 0 : i32
    %387 = vector.broadcast %c0_i32_163 : i32 to vector<8x128xi32>
    %388 = arith.addi %296, %387 : vector<8x128xi32>
    %c0_i32_164 = arith.constant 0 : i32
    %389 = vector.broadcast %c0_i32_164 : i32 to vector<8x128xi32>
    %390 = arith.cmpi sge, %388, %389 : vector<8x128xi32>
    %c0_i32_165 = arith.constant 0 : i32
    %391 = vector.broadcast %c0_i32_165 : i32 to vector<8x128xi32>
    %392 = arith.addi %296, %391 : vector<8x128xi32>
    %c8_i32_166 = arith.constant 8 : i32
    %393 = vector.broadcast %c8_i32_166 : i32 to vector<8x128xi32>
    %394 = arith.cmpi slt, %392, %393 : vector<8x128xi32>
    %395 = arith.andi %390, %394 : vector<8x128xi1>
    %c0_i32_167 = arith.constant 0 : i32
    %396 = vector.broadcast %c0_i32_167 : i32 to vector<8x128xi32>
    %397 = arith.addi %298, %396 : vector<8x128xi32>
    %c0_i32_168 = arith.constant 0 : i32
    %398 = vector.broadcast %c0_i32_168 : i32 to vector<8x128xi32>
    %399 = arith.cmpi sge, %397, %398 : vector<8x128xi32>
    %400 = arith.andi %395, %399 : vector<8x128xi1>
    %c0_i32_169 = arith.constant 0 : i32
    %401 = vector.broadcast %c0_i32_169 : i32 to vector<8x128xi32>
    %402 = arith.addi %298, %401 : vector<8x128xi32>
    %c8_i32_170 = arith.constant 8 : i32
    %403 = vector.broadcast %c8_i32_170 : i32 to vector<8x128xi32>
    %404 = arith.cmpi slt, %402, %403 : vector<8x128xi32>
    %405 = arith.andi %400, %404 : vector<8x128xi1>
    %cst_171 = arith.constant 0.000000e+00 : f32
    %406 = vector.broadcast %cst_171 : f32 to vector<8x128xf32>
    %407 = arith.select %405, %293, %406 : vector<8x128xi1>, vector<8x128xf32>
    %c127_i32_172 = arith.constant 127 : i32
    %408 = tpu.dynamic_rotate %293 by %c127_i32_172 dim 1 : vector<8x128xf32>, i32 -> vector<8x128xf32>
    %c0_i32_173 = arith.constant 0 : i32
    %409 = vector.broadcast %c0_i32_173 : i32 to vector<8x128xi32>
    %410 = arith.addi %296, %409 : vector<8x128xi32>
    %c0_i32_174 = arith.constant 0 : i32
    %411 = vector.broadcast %c0_i32_174 : i32 to vector<8x128xi32>
    %412 = arith.cmpi sge, %410, %411 : vector<8x128xi32>
    %c0_i32_175 = arith.constant 0 : i32
    %413 = vector.broadcast %c0_i32_175 : i32 to vector<8x128xi32>
    %414 = arith.addi %296, %413 : vector<8x128xi32>
    %c8_i32_176 = arith.constant 8 : i32
    %415 = vector.broadcast %c8_i32_176 : i32 to vector<8x128xi32>
    %416 = arith.cmpi slt, %414, %415 : vector<8x128xi32>
    %417 = arith.andi %412, %416 : vector<8x128xi1>
    %c1_i32_177 = arith.constant 1 : i32
    %418 = vector.broadcast %c1_i32_177 : i32 to vector<8x128xi32>
    %419 = arith.addi %298, %418 : vector<8x128xi32>
    %c0_i32_178 = arith.constant 0 : i32
    %420 = vector.broadcast %c0_i32_178 : i32 to vector<8x128xi32>
    %421 = arith.cmpi sge, %419, %420 : vector<8x128xi32>
    %422 = arith.andi %417, %421 : vector<8x128xi1>
    %c1_i32_179 = arith.constant 1 : i32
    %423 = vector.broadcast %c1_i32_179 : i32 to vector<8x128xi32>
    %424 = arith.addi %298, %423 : vector<8x128xi32>
    %c8_i32_180 = arith.constant 8 : i32
    %425 = vector.broadcast %c8_i32_180 : i32 to vector<8x128xi32>
    %426 = arith.cmpi slt, %424, %425 : vector<8x128xi32>
    %427 = arith.andi %422, %426 : vector<8x128xi1>
    %cst_181 = arith.constant 0.000000e+00 : f32
    %428 = vector.broadcast %cst_181 : f32 to vector<8x128xf32>
    %429 = arith.select %427, %408, %428 : vector<8x128xi1>, vector<8x128xf32>
    %c121_i32 = arith.constant 121 : i32
    %430 = tpu.dynamic_rotate %293 by %c121_i32 dim 1 : vector<8x128xf32>, i32 -> vector<8x128xf32>
    %c1_i32_182 = arith.constant 1 : i32
    %431 = vector.broadcast %c1_i32_182 : i32 to vector<8x128xi32>
    %432 = arith.addi %296, %431 : vector<8x128xi32>
    %c0_i32_183 = arith.constant 0 : i32
    %433 = vector.broadcast %c0_i32_183 : i32 to vector<8x128xi32>
    %434 = arith.cmpi sge, %432, %433 : vector<8x128xi32>
    %c1_i32_184 = arith.constant 1 : i32
    %435 = vector.broadcast %c1_i32_184 : i32 to vector<8x128xi32>
    %436 = arith.addi %296, %435 : vector<8x128xi32>
    %c8_i32_185 = arith.constant 8 : i32
    %437 = vector.broadcast %c8_i32_185 : i32 to vector<8x128xi32>
    %438 = arith.cmpi slt, %436, %437 : vector<8x128xi32>
    %439 = arith.andi %434, %438 : vector<8x128xi1>
    %c-1_i32_186 = arith.constant -1 : i32
    %440 = vector.broadcast %c-1_i32_186 : i32 to vector<8x128xi32>
    %441 = arith.addi %298, %440 : vector<8x128xi32>
    %c0_i32_187 = arith.constant 0 : i32
    %442 = vector.broadcast %c0_i32_187 : i32 to vector<8x128xi32>
    %443 = arith.cmpi sge, %441, %442 : vector<8x128xi32>
    %444 = arith.andi %439, %443 : vector<8x128xi1>
    %c-1_i32_188 = arith.constant -1 : i32
    %445 = vector.broadcast %c-1_i32_188 : i32 to vector<8x128xi32>
    %446 = arith.addi %298, %445 : vector<8x128xi32>
    %c8_i32_189 = arith.constant 8 : i32
    %447 = vector.broadcast %c8_i32_189 : i32 to vector<8x128xi32>
    %448 = arith.cmpi slt, %446, %447 : vector<8x128xi32>
    %449 = arith.andi %444, %448 : vector<8x128xi1>
    %cst_190 = arith.constant 0.000000e+00 : f32
    %450 = vector.broadcast %cst_190 : f32 to vector<8x128xf32>
    %451 = arith.select %449, %430, %450 : vector<8x128xi1>, vector<8x128xf32>
    %c120_i32_191 = arith.constant 120 : i32
    %452 = tpu.dynamic_rotate %293 by %c120_i32_191 dim 1 : vector<8x128xf32>, i32 -> vector<8x128xf32>
    %c1_i32_192 = arith.constant 1 : i32
    %453 = vector.broadcast %c1_i32_192 : i32 to vector<8x128xi32>
    %454 = arith.addi %296, %453 : vector<8x128xi32>
    %c0_i32_193 = arith.constant 0 : i32
    %455 = vector.broadcast %c0_i32_193 : i32 to vector<8x128xi32>
    %456 = arith.cmpi sge, %454, %455 : vector<8x128xi32>
    %c1_i32_194 = arith.constant 1 : i32
    %457 = vector.broadcast %c1_i32_194 : i32 to vector<8x128xi32>
    %458 = arith.addi %296, %457 : vector<8x128xi32>
    %c8_i32_195 = arith.constant 8 : i32
    %459 = vector.broadcast %c8_i32_195 : i32 to vector<8x128xi32>
    %460 = arith.cmpi slt, %458, %459 : vector<8x128xi32>
    %461 = arith.andi %456, %460 : vector<8x128xi1>
    %c0_i32_196 = arith.constant 0 : i32
    %462 = vector.broadcast %c0_i32_196 : i32 to vector<8x128xi32>
    %463 = arith.addi %298, %462 : vector<8x128xi32>
    %c0_i32_197 = arith.constant 0 : i32
    %464 = vector.broadcast %c0_i32_197 : i32 to vector<8x128xi32>
    %465 = arith.cmpi sge, %463, %464 : vector<8x128xi32>
    %466 = arith.andi %461, %465 : vector<8x128xi1>
    %c0_i32_198 = arith.constant 0 : i32
    %467 = vector.broadcast %c0_i32_198 : i32 to vector<8x128xi32>
    %468 = arith.addi %298, %467 : vector<8x128xi32>
    %c8_i32_199 = arith.constant 8 : i32
    %469 = vector.broadcast %c8_i32_199 : i32 to vector<8x128xi32>
    %470 = arith.cmpi slt, %468, %469 : vector<8x128xi32>
    %471 = arith.andi %466, %470 : vector<8x128xi1>
    %cst_200 = arith.constant 0.000000e+00 : f32
    %472 = vector.broadcast %cst_200 : f32 to vector<8x128xf32>
    %473 = arith.select %471, %452, %472 : vector<8x128xi1>, vector<8x128xf32>
    %c119_i32 = arith.constant 119 : i32
    %474 = tpu.dynamic_rotate %293 by %c119_i32 dim 1 : vector<8x128xf32>, i32 -> vector<8x128xf32>
    %c1_i32_201 = arith.constant 1 : i32
    %475 = vector.broadcast %c1_i32_201 : i32 to vector<8x128xi32>
    %476 = arith.addi %296, %475 : vector<8x128xi32>
    %c0_i32_202 = arith.constant 0 : i32
    %477 = vector.broadcast %c0_i32_202 : i32 to vector<8x128xi32>
    %478 = arith.cmpi sge, %476, %477 : vector<8x128xi32>
    %c1_i32_203 = arith.constant 1 : i32
    %479 = vector.broadcast %c1_i32_203 : i32 to vector<8x128xi32>
    %480 = arith.addi %296, %479 : vector<8x128xi32>
    %c8_i32_204 = arith.constant 8 : i32
    %481 = vector.broadcast %c8_i32_204 : i32 to vector<8x128xi32>
    %482 = arith.cmpi slt, %480, %481 : vector<8x128xi32>
    %483 = arith.andi %478, %482 : vector<8x128xi1>
    %c1_i32_205 = arith.constant 1 : i32
    %484 = vector.broadcast %c1_i32_205 : i32 to vector<8x128xi32>
    %485 = arith.addi %298, %484 : vector<8x128xi32>
    %c0_i32_206 = arith.constant 0 : i32
    %486 = vector.broadcast %c0_i32_206 : i32 to vector<8x128xi32>
    %487 = arith.cmpi sge, %485, %486 : vector<8x128xi32>
    %488 = arith.andi %483, %487 : vector<8x128xi1>
    %c1_i32_207 = arith.constant 1 : i32
    %489 = vector.broadcast %c1_i32_207 : i32 to vector<8x128xi32>
    %490 = arith.addi %298, %489 : vector<8x128xi32>
    %c8_i32_208 = arith.constant 8 : i32
    %491 = vector.broadcast %c8_i32_208 : i32 to vector<8x128xi32>
    %492 = arith.cmpi slt, %490, %491 : vector<8x128xi32>
    %493 = arith.andi %488, %492 : vector<8x128xi1>
    %cst_209 = arith.constant 0.000000e+00 : f32
    %494 = vector.broadcast %cst_209 : f32 to vector<8x128xf32>
    %495 = arith.select %493, %474, %494 : vector<8x128xi1>, vector<8x128xf32>
    %496 = tpu.concatenate %320, %342, %364, %386, %407, %429, %451, %473, %495 in 0 : vector<8x128xf32>, vector<8x128xf32>, vector<8x128xf32>, vector<8x128xf32>, vector<8x128xf32>, vector<8x128xf32>, vector<8x128xf32>, vector<8x128xf32>, vector<8x128xf32> -> vector<72x128xf32>
    %497 = arith.truncf %496 : vector<72x128xf32> to vector<72x128xbf16>
    %c1_210 = arith.constant 1 : index
    %c0_211 = arith.constant 0 : index
    %c0_212 = arith.constant 0 : index
    %498 = vector.load %arg7[%c1_210, %c0_211, %c0_212] : memref<3x8x72xbf16, #tpu.memory_space<vmem>>, vector<1x8x72xbf16>
    %499 = vector.shape_cast %498 : vector<1x8x72xbf16> to vector<8x72xbf16>
    %cst_213 = arith.constant dense<0.000000e+00> : vector<8x128xf32>
    %500 = tpu.matmul %499, %497, %cst_213 {dimension_numbers = #tpu.dot_dimension_numbers<[1], [0], [0], [1], [0, 0, 1, 1], [], []>} : vector<8x72xbf16>, vector<72x128xbf16>, vector<8x128xf32> -> vector<8x128xf32>
    %501 = vector.extract_strided_slice %233 {offsets = [0, 1], sizes = [8, 1], strides = [1, 1]} : vector<8x2xf32> to vector<8x1xf32>
    %502 = vector.broadcast %501 : vector<8x1xf32> to vector<8x128xf32>
    %503 = arith.addf %500, %502 : vector<8x128xf32>
    %cst_214 = arith.constant 0.000000e+00 : f32
    %504 = vector.broadcast %cst_214 : f32 to vector<8x128xf32>
    %505 = arith.maximumf %503, %504 : vector<8x128xf32>
    %506 = vector.extract_strided_slice %505 {offsets = [0, 0], sizes = [8, 64], strides = [1, 1]} : vector<8x128xf32> to vector<8x64xf32>
    %c0_215 = arith.constant 0 : index
    %c0_216 = arith.constant 0 : index
    %c0_217 = arith.constant 0 : index
    %507 = vector.load %arg10[%c0_215, %c0_216, %c0_217] : memref<1x8x64xf32, #tpu.memory_space<vmem>>, vector<1x8x64xf32>
    %508 = vector.shape_cast %507 : vector<1x8x64xf32> to vector<8x64xf32>
    %509 = vector.shape_cast %506 : vector<8x64xf32> to vector<1x8x64xf32>
    tpu.vector_store %arg10[%c0_215, %c0_216, %c0_217], %509 {strides = array<i32>} : memref<1x8x64xf32, #tpu.memory_space<vmem>>, vector<1x8x64xf32>,
    %c0_218 = arith.constant 0 : index
    %c0_219 = arith.constant 0 : index
    %c0_220 = arith.constant 0 : index
    %510 = vector.load %arg8[%c0_218, %c0_219, %c0_220] : memref<3x8x2xf32, #tpu.memory_space<vmem>>, vector<1x8x2xf32>
    %511 = vector.shape_cast %510 : vector<1x8x2xf32> to vector<8x2xf32>
    %c0_221 = arith.constant 0 : index
    %c0_222 = arith.constant 0 : index
    %c0_223 = arith.constant 0 : index
    %512 = vector.load %arg1[%c0_221, %c0_222, %c0_223] : memref<1x4x256xf32, #tpu.memory_space<vmem>>, vector<1x4x256xf32>
    %513 = vector.shape_cast %512 : vector<1x4x256xf32> to vector<4x256xf32>
    %514 = arith.truncf %513 : vector<4x256xf32> to vector<4x256xbf16>
    %c0_224 = arith.constant 0 : index
    %c0_225 = arith.constant 0 : index
    %515 = vector.load %arg4[%c0_224, %c0_225] : memref<8x4xbf16, #tpu.memory_space<vmem>>, vector<8x4xbf16>
    %cst_226 = arith.constant dense<0.000000e+00> : vector<8x256xf32>
    %516 = tpu.matmul %515, %514, %cst_226 {dimension_numbers = #tpu.dot_dimension_numbers<[1], [0], [0], [1], [0, 0, 1, 1], [], []>} : vector<8x4xbf16>, vector<4x256xbf16>, vector<8x256xf32> -> vector<8x256xf32>
    %517 = vector.extract_strided_slice %511 {offsets = [0, 0], sizes = [8, 1], strides = [1, 1]} : vector<8x2xf32> to vector<8x1xf32>
    %518 = vector.broadcast %517 : vector<8x1xf32> to vector<8x256xf32>
    %519 = arith.addf %516, %518 : vector<8x256xf32>
    %cst_227 = arith.constant 0.000000e+00 : f32
    %520 = vector.broadcast %cst_227 : f32 to vector<8x256xf32>
    %521 = arith.maximumf %519, %520 : vector<8x256xf32>
    %522 = vector.extract_strided_slice %293 {offsets = [0, 0], sizes = [8, 8], strides = [1, 1]} : vector<8x128xf32> to vector<8x8xf32>
    %c120_i32_228 = arith.constant 120 : i32
    %523 = tpu.dynamic_rotate %293 by %c120_i32_228 dim 1 : vector<8x128xf32>, i32 -> vector<8x128xf32>
    %524 = vector.extract_strided_slice %523 {offsets = [0, 0], sizes = [8, 8], strides = [1, 1]} : vector<8x128xf32> to vector<8x8xf32>
    %c112_i32 = arith.constant 112 : i32
    %525 = tpu.dynamic_rotate %293 by %c112_i32 dim 1 : vector<8x128xf32>, i32 -> vector<8x128xf32>
    %526 = vector.extract_strided_slice %525 {offsets = [0, 0], sizes = [8, 8], strides = [1, 1]} : vector<8x128xf32> to vector<8x8xf32>
    %c104_i32 = arith.constant 104 : i32
    %527 = tpu.dynamic_rotate %293 by %c104_i32 dim 1 : vector<8x128xf32>, i32 -> vector<8x128xf32>
    %528 = vector.extract_strided_slice %527 {offsets = [0, 0], sizes = [8, 8], strides = [1, 1]} : vector<8x128xf32> to vector<8x8xf32>
    %c96_i32 = arith.constant 96 : i32
    %529 = tpu.dynamic_rotate %293 by %c96_i32 dim 1 : vector<8x128xf32>, i32 -> vector<8x128xf32>
    %530 = vector.extract_strided_slice %529 {offsets = [0, 0], sizes = [8, 8], strides = [1, 1]} : vector<8x128xf32> to vector<8x8xf32>
    %c88_i32 = arith.constant 88 : i32
    %531 = tpu.dynamic_rotate %293 by %c88_i32 dim 1 : vector<8x128xf32>, i32 -> vector<8x128xf32>
    %532 = vector.extract_strided_slice %531 {offsets = [0, 0], sizes = [8, 8], strides = [1, 1]} : vector<8x128xf32> to vector<8x8xf32>
    %c80_i32 = arith.constant 80 : i32
    %533 = tpu.dynamic_rotate %293 by %c80_i32 dim 1 : vector<8x128xf32>, i32 -> vector<8x128xf32>
    %534 = vector.extract_strided_slice %533 {offsets = [0, 0], sizes = [8, 8], strides = [1, 1]} : vector<8x128xf32> to vector<8x8xf32>
    %c72_i32 = arith.constant 72 : i32
    %535 = tpu.dynamic_rotate %293 by %c72_i32 dim 1 : vector<8x128xf32>, i32 -> vector<8x128xf32>
    %536 = vector.extract_strided_slice %535 {offsets = [0, 0], sizes = [8, 8], strides = [1, 1]} : vector<8x128xf32> to vector<8x8xf32>
    %537 = tpu.concatenate %522, %524, %526, %528, %530, %532, %534, %536 in 0 : vector<8x8xf32>, vector<8x8xf32>, vector<8x8xf32>, vector<8x8xf32>, vector<8x8xf32>, vector<8x8xf32>, vector<8x8xf32>, vector<8x8xf32> -> vector<64x8xf32>
    %538 = arith.truncf %537 : vector<64x8xf32> to vector<64x8xbf16>
    %539 = tpu.iota {dimensions = array<i32: 0>} : vector<8x256xi32>
    %540 = tpu.iota {dimensions = array<i32: 1>} : vector<8x256xi32>
    %c1_i32_229 = arith.constant 1 : i32
    %541 = vector.broadcast %c1_i32_229 : i32 to vector<8x256xi32>
    %542 = arith.shrsi %540, %541 : vector<8x256xi32>
    %c16_i32_230 = arith.constant 16 : i32
    %543 = vector.broadcast %c16_i32_230 : i32 to vector<8x256xi32>
    %544 = arith.cmpi slt, %540, %543 : vector<8x256xi32>
    %545 = arith.cmpi eq, %542, %539 : vector<8x256xi32>
    %546 = arith.andi %544, %545 : vector<8x256xi1>
    %547 = arith.extui %546 : vector<8x256xi1> to vector<8x256xi32>
    %548 = arith.sitofp %547 : vector<8x256xi32> to vector<8x256xf32>
    %549 = arith.truncf %548 : vector<8x256xf32> to vector<8x256xbf16>
    %cst_231 = arith.constant dense<0.000000e+00> : vector<64x256xf32>
    %550 = tpu.matmul %538, %549, %cst_231 {dimension_numbers = #tpu.dot_dimension_numbers<[1], [0], [0], [1], [0, 0, 1, 1], [], []>} : vector<64x8xbf16>, vector<8x256xbf16>, vector<64x256xf32> -> vector<64x256xf32>
    %cst_232 = arith.constant 0.000000e+00 : f32
    %551 = vector.broadcast %cst_232 : f32 to vector<8x256xf32>
    %552 = vector.extract_strided_slice %550 {offsets = [0, 0], sizes = [8, 256], strides = [1, 1]} : vector<64x256xf32> to vector<8x256xf32>
    %553 = arith.addf %551, %552 : vector<8x256xf32>
    %554 = vector.extract_strided_slice %550 {offsets = [0, 0], sizes = [8, 256], strides = [1, 1]} : vector<64x256xf32> to vector<8x256xf32>
    %c16_i32_233 = arith.constant 16 : i32
    %555 = tpu.dynamic_rotate %554 by %c16_i32_233 dim 1 : vector<8x256xf32>, i32 -> vector<8x256xf32>
    %556 = arith.addf %553, %555 : vector<8x256xf32>
    %557 = vector.extract_strided_slice %550 {offsets = [8, 0], sizes = [8, 256], strides = [1, 1]} : vector<64x256xf32> to vector<8x256xf32>
    %c32_i32_234 = arith.constant 32 : i32
    %558 = tpu.dynamic_rotate %557 by %c32_i32_234 dim 1 : vector<8x256xf32>, i32 -> vector<8x256xf32>
    %559 = arith.addf %556, %558 : vector<8x256xf32>
    %560 = vector.extract_strided_slice %550 {offsets = [8, 0], sizes = [8, 256], strides = [1, 1]} : vector<64x256xf32> to vector<8x256xf32>
    %c48_i32_235 = arith.constant 48 : i32
    %561 = tpu.dynamic_rotate %560 by %c48_i32_235 dim 1 : vector<8x256xf32>, i32 -> vector<8x256xf32>
    %562 = arith.addf %559, %561 : vector<8x256xf32>
    %563 = vector.extract_strided_slice %550 {offsets = [16, 0], sizes = [8, 256], strides = [1, 1]} : vector<64x256xf32> to vector<8x256xf32>
    %c64_i32 = arith.constant 64 : i32
    %564 = tpu.dynamic_rotate %563 by %c64_i32 dim 1 : vector<8x256xf32>, i32 -> vector<8x256xf32>
    %565 = arith.addf %562, %564 : vector<8x256xf32>
    %566 = vector.extract_strided_slice %550 {offsets = [16, 0], sizes = [8, 256], strides = [1, 1]} : vector<64x256xf32> to vector<8x256xf32>
    %c80_i32_236 = arith.constant 80 : i32
    %567 = tpu.dynamic_rotate %566 by %c80_i32_236 dim 1 : vector<8x256xf32>, i32 -> vector<8x256xf32>
    %568 = arith.addf %565, %567 : vector<8x256xf32>
    %569 = vector.extract_strided_slice %550 {offsets = [24, 0], sizes = [8, 256], strides = [1, 1]} : vector<64x256xf32> to vector<8x256xf32>
    %c96_i32_237 = arith.constant 96 : i32
    %570 = tpu.dynamic_rotate %569 by %c96_i32_237 dim 1 : vector<8x256xf32>, i32 -> vector<8x256xf32>
    %571 = arith.addf %568, %570 : vector<8x256xf32>
    %572 = vector.extract_strided_slice %550 {offsets = [24, 0], sizes = [8, 256], strides = [1, 1]} : vector<64x256xf32> to vector<8x256xf32>
    %c112_i32_238 = arith.constant 112 : i32
    %573 = tpu.dynamic_rotate %572 by %c112_i32_238 dim 1 : vector<8x256xf32>, i32 -> vector<8x256xf32>
    %574 = arith.addf %571, %573 : vector<8x256xf32>
    %575 = vector.extract_strided_slice %550 {offsets = [32, 0], sizes = [8, 256], strides = [1, 1]} : vector<64x256xf32> to vector<8x256xf32>
    %c128_i32 = arith.constant 128 : i32
    %576 = tpu.dynamic_rotate %575 by %c128_i32 dim 1 : vector<8x256xf32>, i32 -> vector<8x256xf32>
    %577 = arith.addf %574, %576 : vector<8x256xf32>
    %578 = vector.extract_strided_slice %550 {offsets = [32, 0], sizes = [8, 256], strides = [1, 1]} : vector<64x256xf32> to vector<8x256xf32>
    %c144_i32 = arith.constant 144 : i32
    %579 = tpu.dynamic_rotate %578 by %c144_i32 dim 1 : vector<8x256xf32>, i32 -> vector<8x256xf32>
    %580 = arith.addf %577, %579 : vector<8x256xf32>
    %581 = vector.extract_strided_slice %550 {offsets = [40, 0], sizes = [8, 256], strides = [1, 1]} : vector<64x256xf32> to vector<8x256xf32>
    %c160_i32 = arith.constant 160 : i32
    %582 = tpu.dynamic_rotate %581 by %c160_i32 dim 1 : vector<8x256xf32>, i32 -> vector<8x256xf32>
    %583 = arith.addf %580, %582 : vector<8x256xf32>
    %584 = vector.extract_strided_slice %550 {offsets = [40, 0], sizes = [8, 256], strides = [1, 1]} : vector<64x256xf32> to vector<8x256xf32>
    %c176_i32 = arith.constant 176 : i32
    %585 = tpu.dynamic_rotate %584 by %c176_i32 dim 1 : vector<8x256xf32>, i32 -> vector<8x256xf32>
    %586 = arith.addf %583, %585 : vector<8x256xf32>
    %587 = vector.extract_strided_slice %550 {offsets = [48, 0], sizes = [8, 256], strides = [1, 1]} : vector<64x256xf32> to vector<8x256xf32>
    %c192_i32 = arith.constant 192 : i32
    %588 = tpu.dynamic_rotate %587 by %c192_i32 dim 1 : vector<8x256xf32>, i32 -> vector<8x256xf32>
    %589 = arith.addf %586, %588 : vector<8x256xf32>
    %590 = vector.extract_strided_slice %550 {offsets = [48, 0], sizes = [8, 256], strides = [1, 1]} : vector<64x256xf32> to vector<8x256xf32>
    %c208_i32 = arith.constant 208 : i32
    %591 = tpu.dynamic_rotate %590 by %c208_i32 dim 1 : vector<8x256xf32>, i32 -> vector<8x256xf32>
    %592 = arith.addf %589, %591 : vector<8x256xf32>
    %593 = vector.extract_strided_slice %550 {offsets = [56, 0], sizes = [8, 256], strides = [1, 1]} : vector<64x256xf32> to vector<8x256xf32>
    %c224_i32 = arith.constant 224 : i32
    %594 = tpu.dynamic_rotate %593 by %c224_i32 dim 1 : vector<8x256xf32>, i32 -> vector<8x256xf32>
    %595 = arith.addf %592, %594 : vector<8x256xf32>
    %596 = vector.extract_strided_slice %550 {offsets = [56, 0], sizes = [8, 256], strides = [1, 1]} : vector<64x256xf32> to vector<8x256xf32>
    %c240_i32 = arith.constant 240 : i32
    %597 = tpu.dynamic_rotate %596 by %c240_i32 dim 1 : vector<8x256xf32>, i32 -> vector<8x256xf32>
    %598 = arith.addf %595, %597 : vector<8x256xf32>
    %599 = arith.addf %521, %598 : vector<8x256xf32>
    %600 = tpu.iota {dimensions = array<i32: 1>} : vector<8x256xi32>
    %c4_i32_239 = arith.constant 4 : i32
    %601 = vector.broadcast %c4_i32_239 : i32 to vector<8x256xi32>
    %602 = arith.shrsi %600, %601 : vector<8x256xi32>
    %c15_i32 = arith.constant 15 : i32
    %603 = vector.broadcast %c15_i32 : i32 to vector<8x256xi32>
    %604 = arith.andi %600, %603 : vector<8x256xi32>
    %c17_i32 = arith.constant 17 : i32
    %605 = tpu.dynamic_rotate %599 by %c17_i32 dim 1 : vector<8x256xf32>, i32 -> vector<8x256xf32>
    %c-1_i32_240 = arith.constant -1 : i32
    %606 = vector.broadcast %c-1_i32_240 : i32 to vector<8x256xi32>
    %607 = arith.addi %602, %606 : vector<8x256xi32>
    %c0_i32_241 = arith.constant 0 : i32
    %608 = vector.broadcast %c0_i32_241 : i32 to vector<8x256xi32>
    %609 = arith.cmpi sge, %607, %608 : vector<8x256xi32>
    %c-1_i32_242 = arith.constant -1 : i32
    %610 = vector.broadcast %c-1_i32_242 : i32 to vector<8x256xi32>
    %611 = arith.addi %602, %610 : vector<8x256xi32>
    %c16_i32_243 = arith.constant 16 : i32
    %612 = vector.broadcast %c16_i32_243 : i32 to vector<8x256xi32>
    %613 = arith.cmpi slt, %611, %612 : vector<8x256xi32>
    %614 = arith.andi %609, %613 : vector<8x256xi1>
    %c-1_i32_244 = arith.constant -1 : i32
    %615 = vector.broadcast %c-1_i32_244 : i32 to vector<8x256xi32>
    %616 = arith.addi %604, %615 : vector<8x256xi32>
    %c0_i32_245 = arith.constant 0 : i32
    %617 = vector.broadcast %c0_i32_245 : i32 to vector<8x256xi32>
    %618 = arith.cmpi sge, %616, %617 : vector<8x256xi32>
    %619 = arith.andi %614, %618 : vector<8x256xi1>
    %c-1_i32_246 = arith.constant -1 : i32
    %620 = vector.broadcast %c-1_i32_246 : i32 to vector<8x256xi32>
    %621 = arith.addi %604, %620 : vector<8x256xi32>
    %c16_i32_247 = arith.constant 16 : i32
    %622 = vector.broadcast %c16_i32_247 : i32 to vector<8x256xi32>
    %623 = arith.cmpi slt, %621, %622 : vector<8x256xi32>
    %624 = arith.andi %619, %623 : vector<8x256xi1>
    %cst_248 = arith.constant 0.000000e+00 : f32
    %625 = vector.broadcast %cst_248 : f32 to vector<8x256xf32>
    %626 = arith.select %624, %605, %625 : vector<8x256xi1>, vector<8x256xf32>
    %c16_i32_249 = arith.constant 16 : i32
    %627 = tpu.dynamic_rotate %599 by %c16_i32_249 dim 1 : vector<8x256xf32>, i32 -> vector<8x256xf32>
    %c-1_i32_250 = arith.constant -1 : i32
    %628 = vector.broadcast %c-1_i32_250 : i32 to vector<8x256xi32>
    %629 = arith.addi %602, %628 : vector<8x256xi32>
    %c0_i32_251 = arith.constant 0 : i32
    %630 = vector.broadcast %c0_i32_251 : i32 to vector<8x256xi32>
    %631 = arith.cmpi sge, %629, %630 : vector<8x256xi32>
    %c-1_i32_252 = arith.constant -1 : i32
    %632 = vector.broadcast %c-1_i32_252 : i32 to vector<8x256xi32>
    %633 = arith.addi %602, %632 : vector<8x256xi32>
    %c16_i32_253 = arith.constant 16 : i32
    %634 = vector.broadcast %c16_i32_253 : i32 to vector<8x256xi32>
    %635 = arith.cmpi slt, %633, %634 : vector<8x256xi32>
    %636 = arith.andi %631, %635 : vector<8x256xi1>
    %c0_i32_254 = arith.constant 0 : i32
    %637 = vector.broadcast %c0_i32_254 : i32 to vector<8x256xi32>
    %638 = arith.addi %604, %637 : vector<8x256xi32>
    %c0_i32_255 = arith.constant 0 : i32
    %639 = vector.broadcast %c0_i32_255 : i32 to vector<8x256xi32>
    %640 = arith.cmpi sge, %638, %639 : vector<8x256xi32>
    %641 = arith.andi %636, %640 : vector<8x256xi1>
    %c0_i32_256 = arith.constant 0 : i32
    %642 = vector.broadcast %c0_i32_256 : i32 to vector<8x256xi32>
    %643 = arith.addi %604, %642 : vector<8x256xi32>
    %c16_i32_257 = arith.constant 16 : i32
    %644 = vector.broadcast %c16_i32_257 : i32 to vector<8x256xi32>
    %645 = arith.cmpi slt, %643, %644 : vector<8x256xi32>
    %646 = arith.andi %641, %645 : vector<8x256xi1>
    %cst_258 = arith.constant 0.000000e+00 : f32
    %647 = vector.broadcast %cst_258 : f32 to vector<8x256xf32>
    %648 = arith.select %646, %627, %647 : vector<8x256xi1>, vector<8x256xf32>
    %c15_i32_259 = arith.constant 15 : i32
    %649 = tpu.dynamic_rotate %599 by %c15_i32_259 dim 1 : vector<8x256xf32>, i32 -> vector<8x256xf32>
    %c-1_i32_260 = arith.constant -1 : i32
    %650 = vector.broadcast %c-1_i32_260 : i32 to vector<8x256xi32>
    %651 = arith.addi %602, %650 : vector<8x256xi32>
    %c0_i32_261 = arith.constant 0 : i32
    %652 = vector.broadcast %c0_i32_261 : i32 to vector<8x256xi32>
    %653 = arith.cmpi sge, %651, %652 : vector<8x256xi32>
    %c-1_i32_262 = arith.constant -1 : i32
    %654 = vector.broadcast %c-1_i32_262 : i32 to vector<8x256xi32>
    %655 = arith.addi %602, %654 : vector<8x256xi32>
    %c16_i32_263 = arith.constant 16 : i32
    %656 = vector.broadcast %c16_i32_263 : i32 to vector<8x256xi32>
    %657 = arith.cmpi slt, %655, %656 : vector<8x256xi32>
    %658 = arith.andi %653, %657 : vector<8x256xi1>
    %c1_i32_264 = arith.constant 1 : i32
    %659 = vector.broadcast %c1_i32_264 : i32 to vector<8x256xi32>
    %660 = arith.addi %604, %659 : vector<8x256xi32>
    %c0_i32_265 = arith.constant 0 : i32
    %661 = vector.broadcast %c0_i32_265 : i32 to vector<8x256xi32>
    %662 = arith.cmpi sge, %660, %661 : vector<8x256xi32>
    %663 = arith.andi %658, %662 : vector<8x256xi1>
    %c1_i32_266 = arith.constant 1 : i32
    %664 = vector.broadcast %c1_i32_266 : i32 to vector<8x256xi32>
    %665 = arith.addi %604, %664 : vector<8x256xi32>
    %c16_i32_267 = arith.constant 16 : i32
    %666 = vector.broadcast %c16_i32_267 : i32 to vector<8x256xi32>
    %667 = arith.cmpi slt, %665, %666 : vector<8x256xi32>
    %668 = arith.andi %663, %667 : vector<8x256xi1>
    %cst_268 = arith.constant 0.000000e+00 : f32
    %669 = vector.broadcast %cst_268 : f32 to vector<8x256xf32>
    %670 = arith.select %668, %649, %669 : vector<8x256xi1>, vector<8x256xf32>
    %c1_i32_269 = arith.constant 1 : i32
    %671 = tpu.dynamic_rotate %599 by %c1_i32_269 dim 1 : vector<8x256xf32>, i32 -> vector<8x256xf32>
    %c0_i32_270 = arith.constant 0 : i32
    %672 = vector.broadcast %c0_i32_270 : i32 to vector<8x256xi32>
    %673 = arith.addi %602, %672 : vector<8x256xi32>
    %c0_i32_271 = arith.constant 0 : i32
    %674 = vector.broadcast %c0_i32_271 : i32 to vector<8x256xi32>
    %675 = arith.cmpi sge, %673, %674 : vector<8x256xi32>
    %c0_i32_272 = arith.constant 0 : i32
    %676 = vector.broadcast %c0_i32_272 : i32 to vector<8x256xi32>
    %677 = arith.addi %602, %676 : vector<8x256xi32>
    %c16_i32_273 = arith.constant 16 : i32
    %678 = vector.broadcast %c16_i32_273 : i32 to vector<8x256xi32>
    %679 = arith.cmpi slt, %677, %678 : vector<8x256xi32>
    %680 = arith.andi %675, %679 : vector<8x256xi1>
    %c-1_i32_274 = arith.constant -1 : i32
    %681 = vector.broadcast %c-1_i32_274 : i32 to vector<8x256xi32>
    %682 = arith.addi %604, %681 : vector<8x256xi32>
    %c0_i32_275 = arith.constant 0 : i32
    %683 = vector.broadcast %c0_i32_275 : i32 to vector<8x256xi32>
    %684 = arith.cmpi sge, %682, %683 : vector<8x256xi32>
    %685 = arith.andi %680, %684 : vector<8x256xi1>
    %c-1_i32_276 = arith.constant -1 : i32
    %686 = vector.broadcast %c-1_i32_276 : i32 to vector<8x256xi32>
    %687 = arith.addi %604, %686 : vector<8x256xi32>
    %c16_i32_277 = arith.constant 16 : i32
    %688 = vector.broadcast %c16_i32_277 : i32 to vector<8x256xi32>
    %689 = arith.cmpi slt, %687, %688 : vector<8x256xi32>
    %690 = arith.andi %685, %689 : vector<8x256xi1>
    %cst_278 = arith.constant 0.000000e+00 : f32
    %691 = vector.broadcast %cst_278 : f32 to vector<8x256xf32>
    %692 = arith.select %690, %671, %691 : vector<8x256xi1>, vector<8x256xf32>
    %c0_i32_279 = arith.constant 0 : i32
    %693 = vector.broadcast %c0_i32_279 : i32 to vector<8x256xi32>
    %694 = arith.addi %602, %693 : vector<8x256xi32>
    %c0_i32_280 = arith.constant 0 : i32
    %695 = vector.broadcast %c0_i32_280 : i32 to vector<8x256xi32>
    %696 = arith.cmpi sge, %694, %695 : vector<8x256xi32>
    %c0_i32_281 = arith.constant 0 : i32
    %697 = vector.broadcast %c0_i32_281 : i32 to vector<8x256xi32>
    %698 = arith.addi %602, %697 : vector<8x256xi32>
    %c16_i32_282 = arith.constant 16 : i32
    %699 = vector.broadcast %c16_i32_282 : i32 to vector<8x256xi32>
    %700 = arith.cmpi slt, %698, %699 : vector<8x256xi32>
    %701 = arith.andi %696, %700 : vector<8x256xi1>
    %c0_i32_283 = arith.constant 0 : i32
    %702 = vector.broadcast %c0_i32_283 : i32 to vector<8x256xi32>
    %703 = arith.addi %604, %702 : vector<8x256xi32>
    %c0_i32_284 = arith.constant 0 : i32
    %704 = vector.broadcast %c0_i32_284 : i32 to vector<8x256xi32>
    %705 = arith.cmpi sge, %703, %704 : vector<8x256xi32>
    %706 = arith.andi %701, %705 : vector<8x256xi1>
    %c0_i32_285 = arith.constant 0 : i32
    %707 = vector.broadcast %c0_i32_285 : i32 to vector<8x256xi32>
    %708 = arith.addi %604, %707 : vector<8x256xi32>
    %c16_i32_286 = arith.constant 16 : i32
    %709 = vector.broadcast %c16_i32_286 : i32 to vector<8x256xi32>
    %710 = arith.cmpi slt, %708, %709 : vector<8x256xi32>
    %711 = arith.andi %706, %710 : vector<8x256xi1>
    %cst_287 = arith.constant 0.000000e+00 : f32
    %712 = vector.broadcast %cst_287 : f32 to vector<8x256xf32>
    %713 = arith.select %711, %599, %712 : vector<8x256xi1>, vector<8x256xf32>
    %c255_i32 = arith.constant 255 : i32
    %714 = tpu.dynamic_rotate %599 by %c255_i32 dim 1 : vector<8x256xf32>, i32 -> vector<8x256xf32>
    %c0_i32_288 = arith.constant 0 : i32
    %715 = vector.broadcast %c0_i32_288 : i32 to vector<8x256xi32>
    %716 = arith.addi %602, %715 : vector<8x256xi32>
    %c0_i32_289 = arith.constant 0 : i32
    %717 = vector.broadcast %c0_i32_289 : i32 to vector<8x256xi32>
    %718 = arith.cmpi sge, %716, %717 : vector<8x256xi32>
    %c0_i32_290 = arith.constant 0 : i32
    %719 = vector.broadcast %c0_i32_290 : i32 to vector<8x256xi32>
    %720 = arith.addi %602, %719 : vector<8x256xi32>
    %c16_i32_291 = arith.constant 16 : i32
    %721 = vector.broadcast %c16_i32_291 : i32 to vector<8x256xi32>
    %722 = arith.cmpi slt, %720, %721 : vector<8x256xi32>
    %723 = arith.andi %718, %722 : vector<8x256xi1>
    %c1_i32_292 = arith.constant 1 : i32
    %724 = vector.broadcast %c1_i32_292 : i32 to vector<8x256xi32>
    %725 = arith.addi %604, %724 : vector<8x256xi32>
    %c0_i32_293 = arith.constant 0 : i32
    %726 = vector.broadcast %c0_i32_293 : i32 to vector<8x256xi32>
    %727 = arith.cmpi sge, %725, %726 : vector<8x256xi32>
    %728 = arith.andi %723, %727 : vector<8x256xi1>
    %c1_i32_294 = arith.constant 1 : i32
    %729 = vector.broadcast %c1_i32_294 : i32 to vector<8x256xi32>
    %730 = arith.addi %604, %729 : vector<8x256xi32>
    %c16_i32_295 = arith.constant 16 : i32
    %731 = vector.broadcast %c16_i32_295 : i32 to vector<8x256xi32>
    %732 = arith.cmpi slt, %730, %731 : vector<8x256xi32>
    %733 = arith.andi %728, %732 : vector<8x256xi1>
    %cst_296 = arith.constant 0.000000e+00 : f32
    %734 = vector.broadcast %cst_296 : f32 to vector<8x256xf32>
    %735 = arith.select %733, %714, %734 : vector<8x256xi1>, vector<8x256xf32>
    %c241_i32 = arith.constant 241 : i32
    %736 = tpu.dynamic_rotate %599 by %c241_i32 dim 1 : vector<8x256xf32>, i32 -> vector<8x256xf32>
    %c1_i32_297 = arith.constant 1 : i32
    %737 = vector.broadcast %c1_i32_297 : i32 to vector<8x256xi32>
    %738 = arith.addi %602, %737 : vector<8x256xi32>
    %c0_i32_298 = arith.constant 0 : i32
    %739 = vector.broadcast %c0_i32_298 : i32 to vector<8x256xi32>
    %740 = arith.cmpi sge, %738, %739 : vector<8x256xi32>
    %c1_i32_299 = arith.constant 1 : i32
    %741 = vector.broadcast %c1_i32_299 : i32 to vector<8x256xi32>
    %742 = arith.addi %602, %741 : vector<8x256xi32>
    %c16_i32_300 = arith.constant 16 : i32
    %743 = vector.broadcast %c16_i32_300 : i32 to vector<8x256xi32>
    %744 = arith.cmpi slt, %742, %743 : vector<8x256xi32>
    %745 = arith.andi %740, %744 : vector<8x256xi1>
    %c-1_i32_301 = arith.constant -1 : i32
    %746 = vector.broadcast %c-1_i32_301 : i32 to vector<8x256xi32>
    %747 = arith.addi %604, %746 : vector<8x256xi32>
    %c0_i32_302 = arith.constant 0 : i32
    %748 = vector.broadcast %c0_i32_302 : i32 to vector<8x256xi32>
    %749 = arith.cmpi sge, %747, %748 : vector<8x256xi32>
    %750 = arith.andi %745, %749 : vector<8x256xi1>
    %c-1_i32_303 = arith.constant -1 : i32
    %751 = vector.broadcast %c-1_i32_303 : i32 to vector<8x256xi32>
    %752 = arith.addi %604, %751 : vector<8x256xi32>
    %c16_i32_304 = arith.constant 16 : i32
    %753 = vector.broadcast %c16_i32_304 : i32 to vector<8x256xi32>
    %754 = arith.cmpi slt, %752, %753 : vector<8x256xi32>
    %755 = arith.andi %750, %754 : vector<8x256xi1>
    %cst_305 = arith.constant 0.000000e+00 : f32
    %756 = vector.broadcast %cst_305 : f32 to vector<8x256xf32>
    %757 = arith.select %755, %736, %756 : vector<8x256xi1>, vector<8x256xf32>
    %c240_i32_306 = arith.constant 240 : i32
    %758 = tpu.dynamic_rotate %599 by %c240_i32_306 dim 1 : vector<8x256xf32>, i32 -> vector<8x256xf32>
    %c1_i32_307 = arith.constant 1 : i32
    %759 = vector.broadcast %c1_i32_307 : i32 to vector<8x256xi32>
    %760 = arith.addi %602, %759 : vector<8x256xi32>
    %c0_i32_308 = arith.constant 0 : i32
    %761 = vector.broadcast %c0_i32_308 : i32 to vector<8x256xi32>
    %762 = arith.cmpi sge, %760, %761 : vector<8x256xi32>
    %c1_i32_309 = arith.constant 1 : i32
    %763 = vector.broadcast %c1_i32_309 : i32 to vector<8x256xi32>
    %764 = arith.addi %602, %763 : vector<8x256xi32>
    %c16_i32_310 = arith.constant 16 : i32
    %765 = vector.broadcast %c16_i32_310 : i32 to vector<8x256xi32>
    %766 = arith.cmpi slt, %764, %765 : vector<8x256xi32>
    %767 = arith.andi %762, %766 : vector<8x256xi1>
    %c0_i32_311 = arith.constant 0 : i32
    %768 = vector.broadcast %c0_i32_311 : i32 to vector<8x256xi32>
    %769 = arith.addi %604, %768 : vector<8x256xi32>
    %c0_i32_312 = arith.constant 0 : i32
    %770 = vector.broadcast %c0_i32_312 : i32 to vector<8x256xi32>
    %771 = arith.cmpi sge, %769, %770 : vector<8x256xi32>
    %772 = arith.andi %767, %771 : vector<8x256xi1>
    %c0_i32_313 = arith.constant 0 : i32
    %773 = vector.broadcast %c0_i32_313 : i32 to vector<8x256xi32>
    %774 = arith.addi %604, %773 : vector<8x256xi32>
    %c16_i32_314 = arith.constant 16 : i32
    %775 = vector.broadcast %c16_i32_314 : i32 to vector<8x256xi32>
    %776 = arith.cmpi slt, %774, %775 : vector<8x256xi32>
    %777 = arith.andi %772, %776 : vector<8x256xi1>
    %cst_315 = arith.constant 0.000000e+00 : f32
    %778 = vector.broadcast %cst_315 : f32 to vector<8x256xf32>
    %779 = arith.select %777, %758, %778 : vector<8x256xi1>, vector<8x256xf32>
    %c239_i32 = arith.constant 239 : i32
    %780 = tpu.dynamic_rotate %599 by %c239_i32 dim 1 : vector<8x256xf32>, i32 -> vector<8x256xf32>
    %c1_i32_316 = arith.constant 1 : i32
    %781 = vector.broadcast %c1_i32_316 : i32 to vector<8x256xi32>
    %782 = arith.addi %602, %781 : vector<8x256xi32>
    %c0_i32_317 = arith.constant 0 : i32
    %783 = vector.broadcast %c0_i32_317 : i32 to vector<8x256xi32>
    %784 = arith.cmpi sge, %782, %783 : vector<8x256xi32>
    %c1_i32_318 = arith.constant 1 : i32
    %785 = vector.broadcast %c1_i32_318 : i32 to vector<8x256xi32>
    %786 = arith.addi %602, %785 : vector<8x256xi32>
    %c16_i32_319 = arith.constant 16 : i32
    %787 = vector.broadcast %c16_i32_319 : i32 to vector<8x256xi32>
    %788 = arith.cmpi slt, %786, %787 : vector<8x256xi32>
    %789 = arith.andi %784, %788 : vector<8x256xi1>
    %c1_i32_320 = arith.constant 1 : i32
    %790 = vector.broadcast %c1_i32_320 : i32 to vector<8x256xi32>
    %791 = arith.addi %604, %790 : vector<8x256xi32>
    %c0_i32_321 = arith.constant 0 : i32
    %792 = vector.broadcast %c0_i32_321 : i32 to vector<8x256xi32>
    %793 = arith.cmpi sge, %791, %792 : vector<8x256xi32>
    %794 = arith.andi %789, %793 : vector<8x256xi1>
    %c1_i32_322 = arith.constant 1 : i32
    %795 = vector.broadcast %c1_i32_322 : i32 to vector<8x256xi32>
    %796 = arith.addi %604, %795 : vector<8x256xi32>
    %c16_i32_323 = arith.constant 16 : i32
    %797 = vector.broadcast %c16_i32_323 : i32 to vector<8x256xi32>
    %798 = arith.cmpi slt, %796, %797 : vector<8x256xi32>
    %799 = arith.andi %794, %798 : vector<8x256xi1>
    %cst_324 = arith.constant 0.000000e+00 : f32
    %800 = vector.broadcast %cst_324 : f32 to vector<8x256xf32>
    %801 = arith.select %799, %780, %800 : vector<8x256xi1>, vector<8x256xf32>
    %802 = tpu.concatenate %626, %648, %670, %692, %713, %735, %757, %779, %801 in 0 : vector<8x256xf32>, vector<8x256xf32>, vector<8x256xf32>, vector<8x256xf32>, vector<8x256xf32>, vector<8x256xf32>, vector<8x256xf32>, vector<8x256xf32>, vector<8x256xf32> -> vector<72x256xf32>
    %803 = arith.truncf %802 : vector<72x256xf32> to vector<72x256xbf16>
    %c0_325 = arith.constant 0 : index
    %c0_326 = arith.constant 0 : index
    %c0_327 = arith.constant 0 : index
    %804 = vector.load %arg7[%c0_325, %c0_326, %c0_327] : memref<3x8x72xbf16, #tpu.memory_space<vmem>>, vector<1x8x72xbf16>
    %805 = vector.shape_cast %804 : vector<1x8x72xbf16> to vector<8x72xbf16>
    %cst_328 = arith.constant dense<0.000000e+00> : vector<8x256xf32>
    %806 = tpu.matmul %805, %803, %cst_328 {dimension_numbers = #tpu.dot_dimension_numbers<[1], [0], [0], [1], [0, 0, 1, 1], [], []>} : vector<8x72xbf16>, vector<72x256xbf16>, vector<8x256xf32> -> vector<8x256xf32>
    %807 = vector.extract_strided_slice %511 {offsets = [0, 1], sizes = [8, 1], strides = [1, 1]} : vector<8x2xf32> to vector<8x1xf32>
    %808 = vector.broadcast %807 : vector<8x1xf32> to vector<8x256xf32>
    %809 = arith.addf %806, %808 : vector<8x256xf32>
    %cst_329 = arith.constant 0.000000e+00 : f32
    %810 = vector.broadcast %cst_329 : f32 to vector<8x256xf32>
    %811 = arith.maximumf %809, %810 : vector<8x256xf32>
    %c0_330 = arith.constant 0 : index
    %c0_331 = arith.constant 0 : index
    %c0_332 = arith.constant 0 : index
    %812 = vector.load %arg9[%c0_330, %c0_331, %c0_332] : memref<1x8x256xf32, #tpu.memory_space<vmem>>, vector<1x8x256xf32>
    %813 = vector.shape_cast %812 : vector<1x8x256xf32> to vector<8x256xf32>
    %814 = vector.shape_cast %811 : vector<8x256xf32> to vector<1x8x256xf32>
    tpu.vector_store %arg9[%c0_330, %c0_331, %c0_332], %814 {strides = array<i32>} : memref<1x8x256xf32, #tpu.memory_space<vmem>>, vector<1x8x256xf32>,
    return
  }
  func.func @transform_0(%arg0: i32) -> (i32, i32, i32) {
    %c0_i32 = arith.constant 0 : i32
    %c0_i32_0 = arith.constant 0 : i32
    %c0_i32_1 = arith.constant 0 : i32
    return %arg0, %c0_i32, %c0_i32_0 : i32, i32, i32
  }
  func.func @transform_1(%arg0: i32) -> (i32, i32, i32) {
    %c0_i32 = arith.constant 0 : i32
    %c0_i32_0 = arith.constant 0 : i32
    %c0_i32_1 = arith.constant 0 : i32
    return %arg0, %c0_i32, %c0_i32_0 : i32, i32, i32
  }
  func.func @transform_2(%arg0: i32) -> (i32, i32, i32) {
    %c0_i32 = arith.constant 0 : i32
    %c0_i32_0 = arith.constant 0 : i32
    %c0_i32_1 = arith.constant 0 : i32
    return %arg0, %c0_i32, %c0_i32_0 : i32, i32, i32
  }
  func.func @transform_3(%arg0: i32) -> (i32, i32) {
    %c0_i32 = arith.constant 0 : i32
    %c0_i32_0 = arith.constant 0 : i32
    %c0_i32_1 = arith.constant 0 : i32
    return %c0_i32, %c0_i32_0 : i32, i32
  }
  func.func @transform_4(%arg0: i32) -> (i32, i32) {
    %c0_i32 = arith.constant 0 : i32
    %c0_i32_0 = arith.constant 0 : i32
    %c0_i32_1 = arith.constant 0 : i32
    return %c0_i32, %c0_i32_0 : i32, i32
  }
  func.func @transform_5(%arg0: i32) -> (i32, i32) {
    %c0_i32 = arith.constant 0 : i32
    %c0_i32_0 = arith.constant 0 : i32
    %c0_i32_1 = arith.constant 0 : i32
    return %c0_i32, %c0_i32_0 : i32, i32
  }
  func.func @transform_6(%arg0: i32) -> (i32, i32, i32) {
    %c0_i32 = arith.constant 0 : i32
    %c0_i32_0 = arith.constant 0 : i32
    %c0_i32_1 = arith.constant 0 : i32
    %c0_i32_2 = arith.constant 0 : i32
    return %c0_i32, %c0_i32_0, %c0_i32_1 : i32, i32, i32
  }
  func.func @transform_7(%arg0: i32) -> (i32, i32, i32) {
    %c0_i32 = arith.constant 0 : i32
    %c0_i32_0 = arith.constant 0 : i32
    %c0_i32_1 = arith.constant 0 : i32
    %c0_i32_2 = arith.constant 0 : i32
    return %c0_i32, %c0_i32_0, %c0_i32_1 : i32, i32, i32
  }
  func.func @transform_8(%arg0: i32) -> (i32, i32, i32) {
    %c0_i32 = arith.constant 0 : i32
    %c0_i32_0 = arith.constant 0 : i32
    %c0_i32_1 = arith.constant 0 : i32
    return %arg0, %c0_i32, %c0_i32_0 : i32, i32, i32
  }
  func.func @transform_9(%arg0: i32) -> (i32, i32, i32) {
    %c0_i32 = arith.constant 0 : i32
    %c0_i32_0 = arith.constant 0 : i32
    %c0_i32_1 = arith.constant 0 : i32
    return %arg0, %c0_i32, %c0_i32_0 : i32, i32, i32
  }
  func.func @transform_10(%arg0: i32) -> (i32, i32, i32) {
    %c0_i32 = arith.constant 0 : i32
    %c0_i32_0 = arith.constant 0 : i32
    %c0_i32_1 = arith.constant 0 : i32
    return %arg0, %c0_i32, %c0_i32_0 : i32, i32, i32
  }
}

</mosaic_0001>

<bundles_post_ra>
// kernel: tpu_custom_call.1
= control target key start
LH: loop header
LB: loop body
LE: loop exit
PB: predicated region body
PF: predicated region fallthrough
CT: control target
= control target key end

     0   :  { %s3068_s0 = inlined_call_operand.hbm [shape: f32[2,4,256], index: 0, kind: input, shape index: {}]   ;;  %s3069_s1 = inlined_call_operand.hbm [shape: f32[2,8,64], index: 1, kind: input, shape index: {}]   ;;  %s3070_s2 = inlined_call_operand.vmem [shape: f32[2,16,16], index: 2, kind: input, shape index: {}]   ;;  %s3071_s3 = inlined_call_operand.vmem [shape: bf16[8,4], index: 3, kind: input, shape index: {}]   ;;  %s3072_s4 = inlined_call_operand.hbm [shape: bf16[8,8], index: 4, kind: input, shape index: {}]   ;;  %s3073_s5 = inlined_call_operand.hbm [shape: bf16[8,16], index: 5, kind: input, shape index: {}]   ;;  %s3074_s6 = inlined_call_operand.hbm [shape: bf16[3,8,72], index: 6, kind: input, shape index: {}]   ;;  %s3075_s7 = inlined_call_operand.vmem [shape: f32[3,8,2], index: 7, kind: input, shape index: {}]   ;;  %s3076_s8 = inlined_call_operand.hbm [shape: f32[2,8,256], index: 8, kind: output, shape index: {0}]   ;;  %s3077_s9 = inlined_call_operand.hbm [shape: f32[2,8,64], index: 9, kind: output, shape index: {1}]   ;;  %s3078_s10 = inlined_call_operand.hbm [shape: f32[2,8,16], index: 10, kind: output, shape index: {2}]  }
   0x1   :  { %3099 = sst [smem:[#allocation28_spill]] %s3072_s4 }
   0x2   :  { %3100 = sst [smem:[#allocation29_spill]] %s3073_s5 }
   0x3   :  { %3101 = sst [smem:[#allocation30_spill]] %s3074_s6 }
   0x4   :  { %16 = vsyncpa [#allocation4], 0 }
   0x5   :  { %18 = vsyncpa [#allocation4 + $0x1], 0 }
   0x6   :  { %19 = vsyncpa [#allocation7], 0 }
   0x7   :  { %21 = vsyncpa [#allocation7 + $0x1], 0 }
   0x8   :  { %22 = vsyncpa [#allocation10], 0 }
   0x9   :  { %23 = vsyncpa [#allocation5], 0 }
   0xa   :  { %25 = vsyncpa [#allocation5 + $0x1], 0 }
   0xb   :  { %26 = vsyncpa [#allocation14], 0 }
   0xc   :  { %28 = vsyncpa [#allocation14 + $0x1], 0  ;;  %s2237_s13 = smov 0   ;;  %s2239_s14 = smov 0  }
   0xd   :  { %s2241_s15 = smov 0   ;;  %s2243_s16 = smov 0  }
   0xe LB: > { %3102 = sst [smem:[#allocation22_spill]] %s2127_s13  ;;  %s2258_s17 = sadd.s32 4294967295, %s2139_s16   ;;  %s2139_s16 = sphi %s2243_s16, %s3201_s16   ;;  %s2135_s15 = sphi %s2241_s15, %s3203_s15   ;;  %s2131_s14 = sphi %s2239_s14, %s3205_s14   ;;  %s2127_s13 = sphi %s2237_s13, %s3204_s13  }
   0xf   : > { %3103 = sst [smem:[#allocation23_spill]] %s2135_s15  ;;  %s3079_s18 = sadd.s32 4294967294, %s2139_s16  }
  0x10   : > { %3104 = sst [smem:[#allocation24_spill]] %s2139_s16  ;;  %p54_p0 = scmp.ne.s32.totalorder %s2131_s14, %s2127_s13 }
  0x11   : > { %p55_p1 = scmp.eq.s32.totalorder %s2258_s17, 0  ;;  %p235_p2 = scmp.eq.s32.totalorder %s2258_s17, 1 }
  0x12   : > { %p241_p3 = scmp.eq.s32.totalorder %s3079_s18, 1  ;;  %p1572_p5 = scmp.ge.s32.totalorder %s2139_s16, 1 }
  0x13   : > { %p2269_p4 = por %p55_p1, %p54_p0  ;;  %p300_p7 = scmp.lt.s32.totalorder %s2139_s16, 3 }
  0x14   : > { %p2274_p6 = por %p241_p3, %p54_p0  ;;  %s3108_s4 = sld [smem:[#allocation28_spill]] }
  0x15   : > { %p2282_p8 = pnand %p1572_p5, %p300_p7  ;;  %s2141_s25 = smov [#allocation8]  }
  0x16   : > { %s3106_s20 = scalar_select %p2274_p6, 1, 0 }
  0x17   : > { %p1698_p10 = pneg %p2282_p8  ;;  %s317_s26 = sshll.u32 %s2141_s25, 4  ;;  %s318_s26 = int_to_ptr.vmem [resolvable:$true] %s317_s26 }
  0x18   : > { %3107 = sst [smem:[#allocation25_spill]] %s3106_s20  ;;  %s2142_s22 = smov [#allocation9]  }
  0x19   : > { %s3110_s5 = sld [smem:[#allocation29_spill]]  ;;  %p2294_p11 = pnand %p1698_p10, %p55_p1 }
  0x1a   : > { %s315_s23 = sshll.u32 %s3108_s4, 4  ;;  %s3112_s6 = sld [smem:[#allocation30_spill]]  ;;  %s316_s23 = int_to_ptr.hbm [resolvable:$true] %s315_s23 }
  0x1b   : > { %s329_s25 = sshll.u32 %s2142_s22, 4  ;;  %s2143_s27 = smov [#allocation11]   ;;  %s330_s25 = int_to_ptr.vmem [resolvable:$true] %s329_s25 }
  0x1c   : > { %1701 = dma.hbm_to_vmem [thread:$0]  (!%p2294_p11), %s316_s23, 64, %s318_s26, [#allocation7]  }
  0x1d   : > { %s340_s28 = sshll.u32 %s2143_s27, 4  ;;  %s2144_s11 = smov 64   ;;  %s341_s28 = int_to_ptr.vmem [resolvable:$true] %s340_s28 }
  0x1e   : > { %s2145_s12 = smov 4   ;;  %s2308_s22 = sadd.s32 1, %s2139_s16  }
  0x1f   : > { %s327_s29 = sshll.u32 %s3110_s5, 4  ;;  %3113 = sst [smem:[#allocation26_spill]] %s2308_s22  ;;  %s328_s29 = int_to_ptr.hbm [resolvable:$true] %s327_s29 }
  0x20   : > { %s338_s21 = sshll.u32 %s3112_s6, 4  ;;  %s38_s23 = ssub.s32 %s2139_s16, %s2308_s22  ;;  %s339_s21 = int_to_ptr.hbm [resolvable:$true] %s338_s21 }
  0x21   : > { %1704 = dma.hbm_to_vmem [thread:$0]  (!%p2294_p11), %s328_s29, 64, %s330_s25, [#allocation10]  }
  0x22   : > { %1707 = dma.hbm_to_vmem [thread:$0]  (!%p2294_p11), %s339_s21, 192, %s341_s28, [#allocation10], %s2144_s11, %s2144_s11, %s2145_s12  }
  0x23   : > { %s41_s26 = sadd.s32 1, %s2135_s15  ;;  %p39_p12 = scmp.eq.s32.totalorder %s38_s23, 0 }
  0x24   : > { %p48_p13 = scmp.ne.s32.totalorder %s2135_s15, %s2131_s14  ;;  %p49_p0 = scmp.eq.s32.totalorder %s2139_s16, 0 }
  0x25   : > { %p1728_p3 = scmp.lt.s32.totalorder %s2139_s16, 2  ;;  %s357_s30 = sand.u32 1, %s2135_s15  }
  0x26   : > { %s2318_s29 = scalar_select %p39_p12, %s2135_s15, %s41_s26  }
  0x27   : > { %p50_p5 = por %p49_p0, %p48_p13  ;;  %p2322_p7 = por %p235_p2, %p48_p13 }
  0x28   : > { %3114 = sst [smem:[#allocation27_spill]] %s2318_s29  ;;  %s1672_s21 = sshll.u32 %s2139_s16, 3 }
  0x29   : > { %s1577_s27 = sshll.u32 %s357_s30, 3  ;;  %s366_s12 = scalar_lea.hbm %s3068_s0, %s1672_s21 }
  0x2a   : > { %s368_s23 = sshll.u32 %s366_s12, 4  ;;  %s361_s18 = scalar_lea.vmem [#allocation3], %s1577_s27  ;;  %s369_s23 = int_to_ptr.hbm [resolvable:$true] %s368_s23 }
  0x2b   : > { %s370_s4 = sshll.u32 %s361_s18, 4  ;;  %p2333_p10 = pnand %p1728_p3, %p50_p5  ;;  %s371_s4 = int_to_ptr.vmem [resolvable:$true] %s370_s4 }
  0x2c   : > { %s385_s29 = scalar_lea.hbm %s3069_s1, %s1672_s21  ;;  %s377_s15 = sand.u32 1, %s2139_s16  }
  0x2d   : > { %s358_s22 = scalar_lea.sflag [#allocation4], %s357_s30  ;;  %s1941_s28 = sshra.s32 %s369_s23, 4  ;;  %s1942_s28 = int_to_ptr.hbm [resolvable:$true] %s1941_s28 }
  0x2e   : > { %s1943_s11 = scalar_lea.hbm %s1942_s28, 8  ;;  %p1945_p11 = pneg %p2333_p10 }
  0x2f   : > { %p1944_p2 = scmp.ne.s32.totalorder %s1942_s28, %s1943_s11  ;;  %s1948_s20 = scalar_lea.hbm %s3068_s0, 16 }
  0x30   : > { %p1949_p0 = scmp.lt.s32.totalorder %s1942_s28, %s3068_s0  ;;  %p1950_p3 = scmp.lt.s32.totalorder %s1948_s20, %s1943_s11 }
  0x31   : > { %p1946_p12 = pnand %p1945_p11, %p1944_p2 }
  0x32   : > { %p1951_p5 = por %p1950_p3, %p1949_p0 }
  0x33   : > { %p1947_p13 = pneg %p1946_p12 }
  0x35   : > { %p1952_p9 = pnand %p1951_p5, %p1947_p13 }
  0x37   : > { %1955 = shalt.err (!%p1952_p9)
}
  0x38   : > { %1711 = dma.hbm_to_vmem [thread:$0]  (!%p2333_p10), %s369_s23, 128, %s371_s4, %s358_s22  }
  0x39   : > { %s387_s30 = sshll.u32 %s385_s29, 4  ;;  %s381_s21 = scalar_lea.vmem [#allocation6], %s1577_s27  ;;  %s388_s30 = int_to_ptr.hbm [resolvable:$true] %s387_s30 }
  0x3a   : > { %s389_s16 = sshll.u32 %s381_s21, 4  ;;  %s378_s13 = scalar_lea.sflag [#allocation7], %s377_s15  ;;  %s390_s16 = int_to_ptr.vmem [resolvable:$true] %s389_s16 }
  0x3b   : > { %s1971_s18 = sshra.s32 %s388_s30, 4  ;;  %s1978_s11 = scalar_lea.hbm %s3069_s1, 16  ;;  %s1972_s18 = int_to_ptr.hbm [resolvable:$true] %s1971_s18 }
  0x3c   : > { %s1973_s12 = scalar_lea.hbm %s1972_s18, 8  ;;  %p1979_p9 = scmp.lt.s32.totalorder %s1972_s18, %s3069_s1 }
  0x3d   : > { %p1974_p2 = scmp.ne.s32.totalorder %s1972_s18, %s1973_s12  ;;  %p1980_p13 = scmp.lt.s32.totalorder %s1978_s11, %s1973_s12 }
  0x3f   : > { %p1976_p12 = pnand %p1974_p2, %p1945_p11  ;;  %p1981_p3 = por %p1980_p13, %p1979_p9 }
  0x41   : > { %p1977_p0 = pneg %p1976_p12 }
  0x43   : > { %p1982_p5 = pnand %p1981_p3, %p1977_p0 }
  0x45   : > { %1985 = shalt.err (!%p1982_p5)
}
  0x46   : > { %1714 = dma.hbm_to_vmem [thread:$0]  (!%p2333_p10), %s388_s30, 128, %s390_s16, %s378_s13  }
  0x47   : > { %406 = sbr.rel (%p2282_p8) target bundleno = 1392 (0x570), region = 52  ;;  %s2368_s15 = sand.u32 (!%p2282_p8), 1, %s2131_s14  }
  0x48   : > { %s2371_s22 = sshll.u32 (!%p2282_p8), %s2368_s15, 3  ;;  %s409_s29 = scalar_lea.sflag (!%p2282_p8), [#allocation4], %s2368_s15 }
  0x49   : > { %s412_s27 = scalar_lea.vmem (!%p2282_p8), [#allocation3], %s2371_s22 }
  0x4c   : > { %2102 = dma.done.wait (%p2269_p4), %s409_s29, 128  }
  0x4d   : > { %2104 = vsyncadd (%p2269_p4), %s409_s29, 4294967168  ;;  %s418_s13 = sand.u32 1, %s2258_s17   ;;  %s422_s24 = scalar_lea.vmem [#allocation6], %s2371_s22 }
  0x4e   : > { %s419_s16 = scalar_lea.sflag [#allocation7], %s418_s13 }
  0x4f   : > { %2106 = dma.done.wait (%p2269_p4), %s419_s16, 128  }
  0x50   : > { %2108 = vsyncadd (%p2269_p4), %s419_s16, 4294967168 }
  0x51   : > { %2110 = dma.done.wait (%p55_p1), [#allocation7], 64  }
  0x52   : > { %2112 = vsyncadd (%p55_p1), [#allocation7], 4294967232 }
  0x53   : > { %2114 = dma.done.wait (%p55_p1), [#allocation10], 256  }
  0x54   : > { %2116 = vsyncadd (%p55_p1), [#allocation10], 4294967040  ;;  %p495_p8 = scmp.lt.s32.totalorder %s2258_s17, 1  ;;  %v2146_v0 = vmov 0   ;;  %v2403_v4 = vld [vmem:[%s3075_s7 + $0x10] sm:$0xff]  ;;  %vm3087_vm0 = vcmask 130048   ;;  %v534_v18 = vlaneseq }
  0x55   : > { %1806 = vset.pattern.permute.xlu0 %v2146_v0  ;;  %1807 = vset.pattern.permute.xlu1 %v2146_v0  ;;  %v506_v5 = vld [vmem:[#allocation9] sm:$0xf]  ;;  %v2147_v6 = vmov 0.0   ;;  %v636_v7 = vld [vmem:[%s422_s24] sm:$0xff]  ;;  %vm3092_vm1 = vcmask 1043456   ;;  %vm644_vm2 = vcmask 64512  }
  0x56   : > { %s496_s19 = scalar_select %p495_p8, %s2258_s17, 1  ;;  %509 = vperm.xlu0 %1806, %v2403_v4   ;;  %530 = vst [vmem:[#allocation2] sm:$0xff] %v2147_v6  ;;  %v637_v8 = vpack.c.bf16 %v636_v7, %v636_v7  ;;  %v638_v10 = vld [vmem:[#allocation8] sm:$0xf]  ;;  %v2429_v17 = vld [vmem:[%s3075_s7 + $0x8] sm:$0xff]  ;;  %v2433_v19 = vand.u32 127, %v534_v18 }
  0x57   : > { %s2148_s12 = smov 127   ;;  %s2149_s20 = smov 125   ;;  %v677_v21 = vshrl.u32 %v534_v18, 7  ;;  %vm692_vm6 = vcmask 1041408   ;;  %v606_v53 = vld [vmem:[#allocation11 + $0x8] sm:$0xf] }
  0x58   : > { %s1673_s23 = sshll.u32 %s496_s19, 4  ;;  %v649_v9 = vsel %vm3092_vm1, %v637_v8, 0  ;;  %s2150_s28 = smov 123   ;;  %v536_v20 = vshra.s32 %v2433_v19, 2  ;;  %v678_v22 = vshra.s32 %v2433_v19, 1  ;;  %v537_v23 = vand.u32 3, %v2433_v19 }
  0x59   : > { %s499_s30 = scalar_lea.vmem %s3070_s2, %s1673_s23  ;;  %s2151_s11 = smov 3   ;;  %vm679_vm3 = vcmp.lt.s32.totalorder %v2433_v19, 8 }
  0x5a   : > { %v503_v1 = vld [vmem:[%s499_s30] sm:$0xff]  ;;  %v504_v2 = vld [vmem:[%s499_s30 + $0x8] sm:$0xff]  ;;  %s2152_s5 = smov 124   ;;  %s2153_s4 = smov 1   ;;  %vm2439_vm4 = vcmp.eq.s32.totalorder %v678_v22, %v677_v21  ;;  %v583_v25 = vadd.s32 1, %v536_v20  ;;  %v559_v26 = vadd.s32 1, %v537_v23 }
  0x5b   : > { %v505_v3 = vpack.c.bf16 %v504_v2, %v503_v1  ;;  %s2154_s29 = smov 4   ;;  %s2155_s16 = smov 5   ;;  %vm681_vm5 = vmand %vm679_vm3, %vm2439_vm4  ;;  %v544_v32 = vadd.s32 4294967295, %v537_v23  ;;  %vm567_vm13 = vcmp.ge.s32.totalorder %v536_v20, 0  ;;  %vm568_vm14 = vcmp.lt.s32.totalorder %v536_v20, 4 }
  0x5c   : > { %s2156_s24 = smov 120   ;;  %s2157_s26 = smov 116   ;;  %v1610_v27 = vsel %vm681_vm5, 1.0, %v2147_v6  ;;  %vm584_vm7 = vcmp.ge.s32.totalorder %v583_v25, 0  ;;  %vm585_vm8 = vcmp.lt.s32.totalorder %v583_v25, 4  ;;  %vm562_vm9 = vcmp.lt.s32.totalorder %v559_v26, 4  ;;  %vm2458_vm3 = vmand %vm567_vm13, %vm568_vm14 }
  0x5d   : > { %523 = vmatpush.bf16.msra.mxu0 %v505_v3  ;;  %v684_v29 = vpack.c.bf16 %v1610_v27, %v1610_v27  ;;  %vm2447_vm10 = vmand %vm584_vm7, %vm585_vm8  ;;  %vm545_vm12 = vcmp.ge.s32.totalorder %v544_v32, 0  ;;  %v540_v38 = vadd.s32 4294967295, %v536_v20  ;;  %s2158_s6 = smov 32   ;;  %s2159_s30 = smov 56   ;;  %v844_v27 = vld [vmem:[%s3071_s3] sm:$0xf] }
  0x5e   : > { %vm598_vm11 = vmand %vm2447_vm10, %vm562_vm9  ;;  %s2160_s21 = smov 8   ;;  %s2161_s18 = smov 24  }
  0x5f   : > { %v694_v30 = vsel %vm692_vm6, %v684_v29, 0  ;;  %vm587_vm15 = vmand %vm2447_vm10, %vm545_vm12  ;;  %vm541_vm5 = vcmp.ge.s32.totalorder %v540_v38, 0  ;;  %vm542_vm7 = vcmp.lt.s32.totalorder %v540_v38, 4  ;;  %s2169_s19 = smov 96   ;;  %s2170_s23 = smov 72  }
  0x60   : > { %1594 = vmatmul.msk.bf16.vlgmr.msra.gmra.mxu0 %vm3087_vm0, %v506_v5  ;;  %1675 = vmatpush.bf16.msra.mxu3 %v694_v30  ;;  %vm1595_vm8 = vmpackc.low %vm2447_vm10, %vm587_vm15 }
  0x61   : > { %658 = vmatpush.bf16.msrb.mxu0 %v649_v9  ;;  %vm570_vm14 = vmand %vm2458_vm3, %vm545_vm12 }
  0x70   : > { %1609 = vmatmul.msk.bf16.vlgmr.msrb.gmra.mxu0 %vm644_vm2, %v638_v10  ;;  %v835_v10 = vld [vmem:[%s412_s27] sm:$0xff]  ;;  %s2166_s27 = smov 112  }
  0x71   : > { %837 = vst [vmem:[#allocation1] ss:$2 sm:$0xff] %v835_v10 }
  0xc8   : > { %v510_v11 = vpop.permute.xlu0 %509 }
  0xdd   : > { %v525_v12 = vpop.f32.mrf.mxu0 }
  0xde   : > { %v526_v13 = vadd.f32 %v525_v12, %v510_v11 }
  0xe0   : > { %v529_v14 = vmax.f32 %v526_v13, 0.0 }
  0xe2   : > { %532 = vst.msk [vmem:[#allocation2] sm:$0xff] %vm3087_vm0, %v529_v14  ;;  %vm2467_vm0 = vmand %vm541_vm5, %vm542_vm7  ;;  %vm3091_vm7 = vcmask 588800  }
  0xe3   : > { %vm563_vm10 = vmand %vm2467_vm0, %vm562_vm9 }
  0xe4   : > { %vm1601_vm15 = vmpackc.low %vm570_vm14, %vm563_vm10  ;;  %vm3090_vm10 = vcmp.lt.s32.totalorder %v2433_v19, 112 }
  0xe5   : > { %v527_v15 = vpop.f32.mrf.mxu0  ;;  %vm546_vm5 = vmand %vm2467_vm0, %vm545_vm12 }
  0xe9   : > { %v2411_v16 = vld [vmem:[#allocation2] sm:$0xff] }
  0xea   : > { %665 = vst [vmem:[#allocation2] sm:$0xff] %v2147_v6  ;;  %576 = vrot.lane.b32.xlu2 %v2411_v16, %s2148_s12  ;;  %581 = vrot.lane.b32.xlu1 %v2411_v16, %s2149_s20  ;;  %s2162_s20 = smov 16  }
  0xeb   : > { %595 = vrot.lane.b32.xlu0 %v2411_v16, %s2150_s28  ;;  %s2163_s28 = smov 40  }
  0xed   : > { %v660_v28 = vpop.f32.mrf.mxu0 }
  0xf2   : > { %557 = vrot.lane.b32.xlu2 %v2411_v16, %s2151_s11  ;;  %590 = vrot.lane.b32.xlu1 %v2411_v16, %s2152_s5  ;;  %s2164_s11 = smov 48   ;;  %s2165_s5 = smov 104  }
  0xf3   : > { %565 = vrot.lane.b32.xlu0 %v2411_v16, %s2153_s4 }
  0xf5   : > { %v662_v36 = vpop.f32.mrf.mxu0 }
  0xfa   : > { %550 = vrot.lane.b32.xlu2 %v2411_v16, %s2154_s29  ;;  %538 = vrot.lane.b32.xlu1 %v2411_v16, %s2155_s16  ;;  %s2167_s29 = smov 80   ;;  %s2168_s16 = smov 88  }
  0xfb   : > { %670 = vrot.lane.b32.xlu0 %v2411_v16, %s2156_s24 }
 0x102   : > { %672 = vrot.lane.b32.xlu1 %v2411_v16, %s2157_s26 }
 0x103   : > { %641 = vperm.xlu0 %1806, %v2429_v17  }
 0x144   : > { %v577_v33 = vpop.permute.xlu2 %576 }
 0x145   : > { %v1599_v47 = vpack.c.bf16 %v577_v33, %v2411_v16 }
 0x14c   : > { %v558_v46 = vpop.permute.xlu2 %557 }
 0x154   : > { %v551_v51 = vpop.permute.xlu2 %550 }
 0x15c   : > { %v582_v34 = vpop.permute.xlu1 %581 }
 0x15d   : > { %v596_v35 = vpop.permute.xlu0 %595 }
 0x15e   : > { %v599_v37 = vsel %vm598_vm11, %v596_v35, 0.0  ;;  %vm579_vm11 = vmand %vm2458_vm3, %vm562_vm9 }
 0x15f   : > { %v604_v39 = vpack.c.bf16 %v599_v37, %v599_v37  ;;  %vm1598_vm13 = vmpackc.low %vm579_vm11, %vm2458_vm3  ;;  %vm685_vm3 = vcmask 31744   ;;  %vm1033_vm11 = vcmp.lt.s32.totalorder %v2433_v19, 80 }
 0x160   : > { %vm1604_vm9 = vmpackc.low %vm2467_vm0, %vm546_vm5  ;;  %vm3089_vm0 = vcmp.lt.s32.totalorder %v2433_v19, 16 }
 0x161   : > { %v617_v40 = vsel %vm3092_vm1, %v604_v39, 0  ;;  %vm908_vm12 = vmand %vm3089_vm0, %vm2439_vm4  ;;  %vm1015_vm4 = vcmp.lt.s32.totalorder %v2433_v19, 48 }
 0x162   : > { %622 = vmatpush.bf16.msra.mxu1 %v617_v40  ;;  %v1628_v29 = vsel %vm908_vm12, 1.0, %v2147_v6 }
 0x164   : > { %v591_v42 = vpop.permute.xlu1 %590 }
 0x165   : > { %v1596_v43 = vpack.c.bf16 %v591_v42, %v582_v34  ;;  %v566_v44 = vpop.permute.xlu0 %565  ;;  %v674_v59 = vpack.c.bf16 %v591_v42, %v2411_v16  ;;  %v838_v16 = vld.sshfl [vmem:[#allocation1] sm:$0xff pattern:$0x75316420] }
 0x166   : > { %v1602_v49 = vpack.c.bf16 %v566_v44, %v558_v46  ;;  %v842_v20 = vpack.c.bf16 %v838_v16, %v838_v16 }
 0x167   : > { %1597 = vmatpush.bf16.msk.msra.mxu1 %vm1595_vm8, %v1596_v43  ;;  %vm3088_vm8 = vcmask 523264  }
 0x168   : > { %v854_v23 = vsel %vm692_vm6, %v842_v20, 0 }
 0x169   : > { %866 = vmatpush.bf16.msra.mxu2 %v854_v23 }
 0x16b   : > { %1600 = vmatpush.bf16.msk.msra.mxu1 %vm1598_vm13, %v1599_v47  ;;  %vm1042_vm13 = vcmp.lt.s32.totalorder %v2433_v19, 96 }
 0x16c   : > { %v539_v48 = vpop.permute.xlu1 %538  ;;  %1626 = vmatmul.msk.bf16.vlgmr.msra.gmra.mxu2 %vm685_vm3, %v844_v27 }
 0x16d   : > { %v671_v50 = vpop.permute.xlu0 %670  ;;  %v1605_v52 = vpack.c.bf16 %v551_v51, %v539_v48 }
 0x16f   : > { %1603 = vmatpush.bf16.msk.msra.mxu1 %vm1601_vm15, %v1602_v49  ;;  %v839_v49 = vld.sshfl [vmem:[#allocation1 + $0x8] sm:$0xff pattern:$0x75316420] }
 0x173   : > { %1606 = vmatpush.bf16.msk.msra.mxu1 %vm1604_vm9, %v1605_v52 }
 0x174   : > { %v673_v54 = vpop.permute.xlu1 %672 }
 0x175   : > { %v675_v55 = vpack.c.bf16 %v673_v54, %v671_v50  ;;  %v642_v56 = vpop.permute.xlu0 %641  ;;  %v843_v50 = vpack.c.bf16 %v839_v49, %v839_v49 }
 0x176   : > { %v661_v57 = vadd.f32 %v660_v28, %v642_v56  ;;  %1607 = vmatmul.msk.bf16.vlgmr.msra.gmra.mxu1 %vm3091_vm7, %v606_v53  ;;  %v2171_v28 = vmov 0.0|0.0  }
 0x177   : > { %703 = vmatpush.bf16.msrb.mxu1 %v694_v30  ;;  %1612 = vmatmul.msk.bf16.vlgmr.msra.gmra.mxu3 %vm685_vm3, %v675_v55  ;;  %v914_v30 = vpack.c.bf16 %v1628_v29, %v1628_v29  ;;  %v857_v51 = vsel %vm692_vm6, %v843_v50, 0  ;;  %vm1024_vm6 = vcmp.lt.s32.totalorder %v2433_v19, 64 }
 0x178   : > { %v664_v58 = vmax.f32 %v661_v57, 0.0  ;;  %970 = vmatpush.bf16.msrb.mxu3 %v2171_v28 }
 0x179   : > { %v929_v31 = vsel %vm3092_vm1, %v914_v30, 0 }
 0x17a   : > { %668 = vst.msk [vmem:[#allocation2] sm:$0xff] %vm3088_vm8, %v664_v58  ;;  %941 = vmatpush.bf16.msrb.mxu2 %v929_v31 }
 0x17b   : > { %879 = vmatpush.bf16.msra.mxu1 %v857_v51 }
 0x181   : > { %v669_v25 = vld [vmem:[#allocation2] sm:$0xff] }
 0x186   : > { %1611 = vmatmul.msk.bf16.vlgmr.msrb.gmra.mxu1 %vm685_vm3, %v674_v59 }
 0x196   : > { %1627 = vmatmul.msk.bf16.vlgmr.msra.gmra.mxu1 %vm685_vm3, %v844_v27 }
 0x1ef   : > { %v2535_v41 = vpop.f32.mrf.mxu2 }
 0x1f3   : > { %v2490_v60 = vpop.f32.mrf.mxu1 }
 0x1f7   : > { %v870_v42 = vpop.f32.mrf.mxu2 }
 0x1fa   : > { %v710_v61 = vpop.f32.mrf.mxu3 }
 0x1fb   : > { %v630_v62 = vpop.f32.mrf.mxu1  ;;  %725 = vrot.lane.b32.xlu0 %v710_v61, %s2158_s6 }
 0x202   : > { %v712_v63 = vpop.f32.mrf.mxu3 }
 0x203   : > { %v705_v0 = vpop.f32.mrf.mxu1  ;;  %734 = vrot.lane.b32.xlu0 %v712_v63, %s2159_s30 }
 0x204   : > { %716 = vrot.lane.b32.xlu2 %v705_v0, %s2160_s21 }
 0x20b   : > { %v707_v1 = vpop.f32.mrf.mxu1 }
 0x20c   : > { %722 = vrot.lane.b32.xlu2 %v707_v1, %s2161_s18  ;;  %719 = vrot.lane.b32.xlu1 %v707_v1, %s2162_s20 }
 0x213   : > { %v2605_v27 = vpop.f32.mrf.mxu1 }
 0x214   : > { %728 = vrot.lane.b32.xlu1 %v710_v61, %s2163_s28  ;;  %731 = vrot.lane.b32.xlu2 %v712_v63, %s2164_s11  ;;  %v2580_v63 = vld [vmem:[%s3075_s7] sm:$0xff]  ;;  %s487_s28 = scalar_lea.vmem [#allocation13], %s2371_s22 }
 0x25e   : > { %v717_v2 = vpop.permute.xlu2 %716 }
 0x25f   : > { %v718_v3 = vadd.f32 %v717_v2, %v705_v0 }
 0x266   : > { %v723_v5 = vpop.permute.xlu2 %722 }
 0x26d   : > { %v726_v9 = vpop.permute.xlu0 %725 }
 0x26e   : > { %v732_v15 = vpop.permute.xlu2 %731 }
 0x275   : > { %v735_v21 = vpop.permute.xlu0 %734 }
 0x27e   : > { %v720_v7 = vpop.permute.xlu1 %719 }
 0x27f   : > { %v721_v8 = vadd.f32 %v720_v7, %v718_v3 }
 0x281   : > { %v724_v11 = vadd.f32 %v723_v5, %v721_v8 }
 0x283   : > { %v727_v12 = vadd.f32 %v726_v9, %v724_v11 }
 0x286   : > { %v729_v13 = vpop.permute.xlu1 %728 }
 0x287   : > { %v730_v14 = vadd.f32 %v729_v13, %v727_v12 }
 0x289   : > { %v733_v18 = vadd.f32 %v732_v15, %v730_v14 }
 0x28b   : > { %v736_v22 = vadd.f32 %v735_v21, %v733_v18 }
 0x28d   : > { %v2499_v26 = vadd.f32 %v736_v22, %v669_v25 }
 0x28f   : > { %889 = vrot.lane.b32.xlu0 %v2499_v26, %s2165_s5  ;;  %887 = vrot.lane.b32.xlu2 %v2499_v26, %s2166_s27  ;;  %s2175_s5 = smov 7  }
 0x290   : > { %792 = vrot.lane.b32.xlu1 %v2499_v26, %s2156_s24  ;;  %s2172_s24 = smov 64  }
 0x297   : > { %895 = vrot.lane.b32.xlu0 %v2499_v26, %s2167_s29  ;;  %893 = vrot.lane.b32.xlu2 %v2499_v26, %s2168_s16  ;;  %s2181_s16 = smov 15  }
 0x298   : > { %891 = vrot.lane.b32.xlu1 %v2499_v26, %s2169_s19 }
 0x2a0   : > { %897 = vrot.lane.b32.xlu1 %v2499_v26, %s2170_s23 }
 0x2e9   : > { %v888_v34 = vpop.permute.xlu2 %887 }
 0x2f1   : > { %v894_v36 = vpop.permute.xlu2 %893 }
 0x301   : > { %v890_v24 = vpop.permute.xlu0 %889 }
 0x302   : > { %v2523_v32 = vpop.permute.xlu1 %792  ;;  %v900_v35 = vpack.c.bf16 %v890_v24, %v888_v34 }
 0x303   : > { %v899_v33 = vpack.c.bf16 %v2523_v32, %v2499_v26 }
 0x305   : > { %1629 = vmatmul.msk.bf16.vlgmr.msrb.gmra.mxu2 %vm644_vm2, %v899_v33  ;;  %1633 = vmatmul.msk.bf16.vlgmr.msrb.gmra.mxu3 %vm644_vm2, %v899_v33 }
 0x309   : > { %v896_v39 = vpop.permute.xlu0 %895 }
 0x30a   : > { %v892_v6 = vpop.permute.xlu1 %891 }
 0x30b   : > { %v901_v37 = vpack.c.bf16 %v894_v36, %v892_v6 }
 0x312   : > { %v898_v38 = vpop.permute.xlu1 %897 }
 0x313   : > { %v902_v40 = vpack.c.bf16 %v898_v38, %v896_v39 }
 0x315   : > { %1630 = vmatmul.msk.bf16.gmra.mxu2 %vm644_vm2, %v900_v35  ;;  %1634 = vmatmul.msk.bf16.gmra.mxu3 %vm644_vm2, %v900_v35 }
 0x325   : > { %1631 = vmatmul.msk.bf16.gmra.mxu2 %vm644_vm2, %v901_v37  ;;  %1635 = vmatmul.msk.bf16.gmra.mxu3 %vm644_vm2, %v901_v37 }
 0x335   : > { %1632 = vmatmul.msk.bf16.gmra.mxu2 %vm644_vm2, %v902_v40  ;;  %1636 = vmatmul.msk.bf16.gmra.mxu3 %vm644_vm2, %v902_v40  ;;  %vm1006_vm2 = vcmp.lt.s32.totalorder %v2433_v19, 32 }
 0x388   : > { %v2537_v43 = vpop.f32.mrf.mxu2  ;;  %v2539_v44 = vpop.f32.mrf.mxu3 }
 0x389   : > { %996 = vrot.lane.b32.xlu0 %v2539_v44, %s2162_s20  ;;  %994 = vrot.lane.b32.xlu2 %v2537_v43, %s2162_s20 }
 0x390   : > { %v945_v45 = vpop.f32.mrf.mxu2  ;;  %v974_v46 = vpop.f32.mrf.mxu3 }
 0x391   : > { %1004 = vrot.lane.b32.xlu2 %v974_v46, %s2158_s6  ;;  %1011 = vrot.lane.b32.xlu0 %v945_v45, %s2164_s11 }
 0x392   : > { %1002 = vrot.lane.b32.xlu1 %v945_v45, %s2158_s6 }
 0x398   : > { %v948_v47 = vpop.f32.mrf.mxu2  ;;  %v977_v48 = vpop.f32.mrf.mxu3 }
 0x399   : > { %1022 = vrot.lane.b32.xlu0 %v977_v48, %s2172_s24  ;;  %1020 = vrot.lane.b32.xlu2 %v948_v47, %s2172_s24 }
 0x39a   : > { %1013 = vrot.lane.b32.xlu1 %v974_v46, %s2164_s11 }
 0x3a0   : > { %v950_v52 = vpop.f32.mrf.mxu2  ;;  %v979_v53 = vpop.f32.mrf.mxu3 }
 0x3a1   : > { %1031 = vrot.lane.b32.xlu2 %v977_v48, %s2167_s29  ;;  %1038 = vrot.lane.b32.xlu0 %v950_v52, %s2169_s19 }
 0x3a2   : > { %1029 = vrot.lane.b32.xlu1 %v948_v47, %s2167_s29 }
 0x3a8   : > { %v2556_v54 = vpop.f32.mrf.mxu2  ;;  %v2560_v55 = vpop.f32.mrf.mxu3 }
 0x3a9   : > { %1047 = vrot.lane.b32.xlu2 %v950_v52, %s2166_s27  ;;  %1049 = vrot.lane.b32.xlu0 %v979_v53, %s2166_s27 }
 0x3aa   : > { %1040 = vrot.lane.b32.xlu1 %v979_v53, %s2169_s19 }
 0x3b0   : > { %v955_v56 = vpop.f32.mrf.mxu2  ;;  %v984_v57 = vpop.f32.mrf.mxu3 }
 0x3b1   : > { %1060 = vrot.lane.b32.xlu2 %v2560_v55, %s2162_s20  ;;  %1066 = vrot.lane.b32.xlu0 %v955_v56, %s2158_s6 }
 0x3b2   : > { %1058 = vrot.lane.b32.xlu1 %v2556_v54, %s2162_s20 }
 0x3b8   : > { %v958_v58 = vpop.f32.mrf.mxu2  ;;  %v987_v59 = vpop.f32.mrf.mxu3 }
 0x3b9   : > { %1074 = vrot.lane.b32.xlu2 %v955_v56, %s2164_s11  ;;  %1076 = vrot.lane.b32.xlu0 %v984_v57, %s2164_s11  ;;  %s2174_s11 = smov 119  }
 0x3ba   : > { %1068 = vrot.lane.b32.xlu1 %v984_v57, %s2158_s6  ;;  %s2173_s6 = smov 121  }
 0x3c0   : > { %v960_v61 = vpop.f32.mrf.mxu2  ;;  %v989_v62 = vpop.f32.mrf.mxu3 }
 0x3c1   : > { %1084 = vrot.lane.b32.xlu2 %v987_v59, %s2172_s24  ;;  %1090 = vrot.lane.b32.xlu0 %v958_v58, %s2167_s29 }
 0x3c2   : > { %1082 = vrot.lane.b32.xlu1 %v958_v58, %s2172_s24 }
 0x3c9   : > { %1100 = vrot.lane.b32.xlu0 %v989_v62, %s2169_s19  ;;  %1098 = vrot.lane.b32.xlu2 %v960_v61, %s2169_s19 }
 0x3ca   : > { %1092 = vrot.lane.b32.xlu1 %v987_v59, %s2167_s29  ;;  %s2176_s29 = smov 9  }
 0x3d1   : > { %1108 = vrot.lane.b32.xlu0 %v989_v62, %s2166_s27  ;;  %1106 = vrot.lane.b32.xlu2 %v960_v61, %s2166_s27 }
 0x3d2   : > { %847 = vperm.xlu1 %1807, %v2580_v63  }
 0x3d9   : > { %783 = vrot.lane.b32.xlu2 %v2499_v26, %s2173_s6  ;;  %s1358_s6 = sshll.u32 %s487_s28, 4  ;;  %s1359_s6 = int_to_ptr.vmem [resolvable:$true] %s1358_s6 }
 0x3da   : > { %797 = vrot.lane.b32.xlu1 %v2499_v26, %s2174_s11 }
 0x3e1   : > { %767 = vrot.lane.b32.xlu2 %v2499_v26, %s2153_s4 }
 0x3e2   : > { %759 = vrot.lane.b32.xlu1 %v2499_v26, %s2175_s5 }
 0x3e3   : > { %v995_v0 = vpop.permute.xlu2 %994 }
 0x3e9   : > { %752 = vrot.lane.b32.xlu2 %v2499_v26, %s2160_s21  ;;  %s2178_s21 = smov 17  }
 0x3ea   : > { %740 = vrot.lane.b32.xlu1 %v2499_v26, %s2176_s29 }
 0x3eb   : > { %v1005_v1 = vpop.permute.xlu2 %1004 }
 0x3f3   : > { %v1021_v3 = vpop.permute.xlu2 %1020 }
 0x3fb   : > { %v997_v2 = vpop.permute.xlu0 %996  ;;  %v1032_v8 = vpop.permute.xlu2 %1031 }
 0x3fc   : > { %v998_v16 = vsel %vm3089_vm0, %v995_v0, %v997_v2  ;;  %v999_v18 = vsel %vm3089_vm0, %v997_v2, %v995_v0 }
 0x3fd   : > { %v1000_v23 = vadd.f32 %v999_v18, %v2537_v43  ;;  %v1001_v25 = vadd.f32 %v998_v16, %v2539_v44  ;;  %v883_v43 = vpop.f32.mrf.mxu1 }
 0x403   : > { %v1012_v5 = vpop.permute.xlu0 %1011  ;;  %v1048_v11 = vpop.permute.xlu2 %1047 }
 0x404   : > { %v1003_v7 = vpop.permute.xlu1 %1002 }
 0x405   : > { %v1007_v21 = vsel %vm1006_vm2, %v1003_v7, %v1005_v1  ;;  %v1008_v22 = vsel %vm1006_vm2, %v1005_v1, %v1003_v7 }
 0x406   : > { %v1009_v30 = vadd.f32 %v1008_v22, %v1000_v23  ;;  %v1010_v31 = vadd.f32 %v1007_v21, %v1001_v25  ;;  %v2650_v21 = vshra.s32 %v2433_v19, 3 }
 0x40b   : > { %v1023_v9 = vpop.permute.xlu0 %1022  ;;  %v1061_v14 = vpop.permute.xlu2 %1060 }
 0x40c   : > { %v1014_v10 = vpop.permute.xlu1 %1013  ;;  %v1025_v36 = vsel %vm1024_vm6, %v1021_v3, %v1023_v9  ;;  %v1026_v37 = vsel %vm1024_vm6, %v1023_v9, %v1021_v3 }
 0x40d   : > { %v1016_v28 = vsel %vm1015_vm4, %v1012_v5, %v1014_v10  ;;  %v1017_v29 = vsel %vm1015_vm4, %v1014_v10, %v1012_v5 }
 0x40e   : > { %v1018_v33 = vadd.f32 %v1017_v29, %v1009_v30  ;;  %v1019_v24 = vadd.f32 %v1016_v28, %v1010_v31  ;;  %v739_v31 = vand.u32 7, %v2433_v19 }
 0x410   : > { %v1027_v40 = vadd.f32 %v1026_v37, %v1018_v33  ;;  %v1028_v42 = vadd.f32 %v1025_v36, %v1019_v24  ;;  %v785_v33 = vadd.s32 1, %v2650_v21 }
 0x412   : > { %vm786_vm14 = vcmp.ge.s32.totalorder %v785_v33, 0  ;;  %vm787_vm15 = vcmp.lt.s32.totalorder %v785_v33, 8 }
 0x413   : > { %v1039_v12 = vpop.permute.xlu0 %1038  ;;  %v1075_v6 = vpop.permute.xlu2 %1074  ;;  %vm2671_vm9 = vmand %vm786_vm14, %vm787_vm15 }
 0x414   : > { %v1030_v13 = vpop.permute.xlu1 %1029 }
 0x415   : > { %v1034_v38 = vsel %vm1033_vm11, %v1030_v13, %v1032_v8  ;;  %v1035_v39 = vsel %vm1033_vm11, %v1032_v8, %v1030_v13 }
 0x416   : > { %v1036_v46 = vadd.f32 %v1035_v39, %v1027_v40  ;;  %v1037_v47 = vadd.f32 %v1034_v38, %v1028_v42  ;;  %v2662_v38 = vadd.s32 1, %v739_v31 }
 0x418   : > { %vm764_vm5 = vcmp.lt.s32.totalorder %v2662_v38, 8 }
 0x419   : > { %vm800_vm3 = vmand %vm2671_vm9, %vm764_vm5 }
 0x41b   : > { %v1050_v15 = vpop.permute.xlu0 %1049  ;;  %v1085_v56 = vpop.permute.xlu2 %1084 }
 0x41c   : > { %v1041_v20 = vpop.permute.xlu1 %1040  ;;  %v1052_v52 = vsel %vm3090_vm10, %v1048_v11, %v1050_v15  ;;  %v1053_v53 = vsel %vm3090_vm10, %v1050_v15, %v1048_v11  ;;  %v2177_v11 = vmov 1  }
 0x41d   : > { %v1043_v44 = vsel %vm1042_vm13, %v1039_v12, %v1041_v20  ;;  %v1044_v45 = vsel %vm1042_vm13, %v1041_v20, %v1039_v12  ;;  %1849 = vset.pattern.permute.xlu2 %v2177_v11  ;;  %1848 = vset.pattern.permute.xlu1 %v2177_v11 }
 0x41e   : > { %v1045_v48 = vadd.f32 %v1044_v45, %v1036_v46  ;;  %v1046_v49 = vadd.f32 %v1043_v44, %v1037_v47  ;;  %1850 = vset.pattern.permute.xlu0 %v2177_v11 }
 0x420   : > { %v1054_v57 = vadd.f32 %v1053_v53, %v1045_v48  ;;  %v1055_v58 = vadd.f32 %v1052_v52, %v1046_v49  ;;  %v2679_v52 = vadd.s32 4294967295, %v739_v31  ;;  %v808_v49 = vld [vmem:[#allocation11 + $0x4] sm:$0xf] }
 0x422   : > { %v1056_v62 = vadd.f32 %v1054_v57, %v2560_v55  ;;  %v1057_v0 = vadd.f32 %v1055_v58, %v2556_v54  ;;  %vm747_vm12 = vcmp.ge.s32.totalorder %v2679_v52, 0  ;;  %v3157_v52 = vmov 0 }
 0x423   : > { %v1067_v34 = vpop.permute.xlu0 %1066  ;;  %v1099_v12 = vpop.permute.xlu2 %1098 }
 0x424   : > { %v1059_v35 = vpop.permute.xlu1 %1058 }
 0x425   : > { %v1062_v59 = vsel %vm3089_vm0, %v1059_v35, %v1061_v14  ;;  %v1063_v61 = vsel %vm3089_vm0, %v1061_v14, %v1059_v35 }
 0x426   : > { %v1064_v7 = vadd.f32 %v1062_v59, %v1056_v62  ;;  %v1065_v8 = vadd.f32 %v1063_v61, %v1057_v0 }
 0x42b   : > { %v1077_v50 = vpop.permute.xlu0 %1076  ;;  %v1107_v35 = vpop.permute.xlu2 %1106 }
 0x42c   : > { %v1069_v51 = vpop.permute.xlu1 %1068  ;;  %v1078_v54 = vsel %vm1015_vm4, %v1075_v6, %v1077_v50  ;;  %v1079_v55 = vsel %vm1015_vm4, %v1077_v50, %v1075_v6 }
 0x42d   : > { %v1070_v2 = vsel %vm1006_vm2, %v1067_v34, %v1069_v51  ;;  %v1071_v3 = vsel %vm1006_vm2, %v1069_v51, %v1067_v34  ;;  %vm789_vm2 = vmand %vm2671_vm9, %vm747_vm12 }
 0x42e   : > { %v1072_v9 = vadd.f32 %v1070_v2, %v1064_v7  ;;  %v1073_v10 = vadd.f32 %v1071_v3, %v1065_v8  ;;  %vm1613_vm4 = vmpackc.low %vm2671_vm9, %vm789_vm2  ;;  %v903_v3 = vadd.s32 128, %v2433_v19  ;;  %v1116_v7 = vshra.s32 %v2433_v19, 4 }
 0x42f   : > { %vm3129_vm9 = vcmask 130048  }
 0x430   : > { %v1080_v15 = vadd.f32 %v1078_v54, %v1072_v9  ;;  %v1081_v16 = vadd.f32 %v1079_v55, %v1073_v10  ;;  %v1117_v9 = vshra.s32 %v903_v3, 4  ;;  %v1118_v10 = vand.u32 15, %v2433_v19 }
 0x431   : > { %v1227_v11 = vadd.s32 1, %v1116_v7  ;;  %v1119_v54 = vand.u32 15, %v903_v3 }
 0x433   : > { %v1091_v1 = vpop.permute.xlu0 %1090  ;;  %v784_v59 = vpop.permute.xlu2 %783 }
 0x434   : > { %v1083_v5 = vpop.permute.xlu1 %1082  ;;  %v1614_v61 = vpack.c.bf16 %v2523_v32, %v784_v59 }
 0x435   : > { %v1086_v13 = vsel %vm1024_vm6, %v1083_v5, %v1085_v56  ;;  %v1087_v14 = vsel %vm1024_vm6, %v1085_v56, %v1083_v5  ;;  %vm769_vm6 = vcmp.ge.s32.totalorder %v2650_v21, 0 }
 0x436   : > { %v1088_v22 = vadd.f32 %v1086_v13, %v1080_v15  ;;  %v1089_v23 = vadd.f32 %v1087_v14, %v1081_v16  ;;  %v1228_v13 = vadd.s32 1, %v1117_v9  ;;  %v2758_v16 = vadd.s32 1, %v1118_v10 }
 0x438   : > { %vm1232_vm8 = vcmp.lt.s32.totalorder %v1228_v13, 16  ;;  %vm3094_vm0 = vcmp.lt.s32.totalorder %v2758_v16, 16 }
 0x43b   : > { %v1101_v18 = vpop.permute.xlu0 %1100  ;;  %v768_v62 = vpop.permute.xlu2 %767 }
 0x43c   : > { %v1093_v20 = vpop.permute.xlu1 %1092  ;;  %v1102_v24 = vsel %vm1042_vm13, %v1099_v12, %v1101_v18  ;;  %v1103_v34 = vsel %vm1042_vm13, %v1101_v18, %v1099_v12 }
 0x43d   : > { %v1094_v25 = vsel %vm1033_vm11, %v1091_v1, %v1093_v20  ;;  %v1095_v28 = vsel %vm1033_vm11, %v1093_v20, %v1091_v1  ;;  %vm770_vm11 = vcmp.lt.s32.totalorder %v2650_v21, 8  ;;  %v2761_v20 = vadd.s32 4294967295, %v1118_v10 }
 0x43e   : > { %v1096_v29 = vadd.f32 %v1094_v25, %v1088_v22  ;;  %v1097_v30 = vadd.f32 %v1095_v28, %v1089_v23  ;;  %vm2719_vm15 = vmand %vm769_vm6, %vm770_vm11  ;;  %vm1229_vm11 = vcmp.ge.s32.totalorder %v1227_v11, 0  ;;  %v2767_v22 = vadd.s32 1, %v1119_v54 }
 0x43f   : > { %vm2736_vm2 = vmand %vm2719_vm15, %vm764_vm5  ;;  %v2788_v28 = vadd.s32 4294967295, %v1119_v54 }
 0x440   : > { %v1104_v36 = vadd.f32 %v1102_v24, %v1096_v29  ;;  %v1105_v37 = vadd.f32 %v1103_v34, %v1097_v30  ;;  %vm2754_vm6 = vmand %vm2719_vm15, %vm747_vm12  ;;  %vm3095_vm7 = vcmp.lt.s32.totalorder %v2767_v22, 16 }
 0x443   : > { %v1109_v6 = vpop.permute.xlu0 %1108  ;;  %v2707_v0 = vpop.permute.xlu2 %752 }
 0x444   : > { %v1110_v39 = vsel %vm3090_vm10, %v1107_v35, %v1109_v6  ;;  %v1111_v40 = vsel %vm3090_vm10, %v1109_v6, %v1107_v35  ;;  %v848_v42 = vpop.permute.xlu1 %847 }
 0x445   : > { %v1112_v43 = vadd.f32 %v1110_v39, %v1104_v36  ;;  %v1113_v44 = vadd.f32 %v1111_v40, %v1105_v37  ;;  %v869_v45 = vadd.f32 %v2535_v41, %v848_v42  ;;  %v882_v46 = vadd.f32 %v2605_v27, %v848_v42 }
 0x446   : > { %v1127_v36 = vadd.s32 4294967295, %v1116_v7 }
 0x447   : > { %v885_v47 = vmax.f32 %v869_v45, 0.0  ;;  %v886_v48 = vmax.f32 %v882_v46, 0.0  ;;  %v1128_v45 = vadd.s32 4294967295, %v1117_v9 }
 0x449   : > { %v2675_v50 = vadd.f32 %v1112_v43, %v885_v47  ;;  %v2677_v51 = vadd.f32 %v1113_v44, %v886_v48  ;;  %v3152_v44 = vmov 0 }
 0x44b   : > { %1209 = vrot.lane.b32.xlu2 %v2677_v51, %s2148_s12  ;;  %v1823_v41 = vpack.i.bf16 %v2677_v51, %v2675_v50  ;;  %v1808_v27 = vpack.i.bf16 %v2675_v50, %v2499_v26 }
 0x44c   : > { %v798_v53 = vpop.permute.xlu1 %797 }
 0x44d   : > { %v801_v56 = vsel %vm800_vm3, %v798_v53, 0.0  ;;  %1824 = vrot.lane.b32.xlu1 %v1823_v41, %s2166_s27  ;;  %1809 = vrot.lane.b32.xlu0 %v1808_v27, %s2148_s12  ;;  %s2179_s12 = smov 111   ;;  %s2180_s27 = smov 113  }
 0x44e   : > { %v806_v57 = vpack.c.bf16 %v801_v56, %v801_v56 }
 0x450   : > { %v817_v58 = vsel %vm3092_vm1, %v806_v57, 0 }
 0x451   : > { %822 = vmatpush.bf16.msra.mxu0 %v817_v58 }
 0x453   : > { %1839 = vrot.lane.b32.xlu2 %v1823_v41, %s2178_s21  ;;  %s1326_s21 = scalar_lea.sflag [#allocation14], %s418_s13 }
 0x454   : > { %v760_v5 = vpop.permute.xlu1 %759 }
 0x455   : > { %1834 = vrot.lane.b32.xlu1 %v1823_v41, %s2153_s4  ;;  %1814 = vrot.lane.b32.xlu0 %v1823_v41, %s2179_s12  ;;  %s494_s4 = scalar_lea.vmem [#allocation15], %s2371_s22  ;;  %v1620_v30 = vpack.c.bf16 %v768_v62, %v760_v5 }
 0x456   : > { %1615 = vmatpush.bf16.msk.msra.mxu0 %vm1613_vm4, %v1614_v61  ;;  %s3000_s29 = sshll.u32 %s494_s4, 4  ;;  %s1373_s29 = int_to_ptr.vmem [resolvable:$true] %s3000_s29 }
 0x45b   : > { %608 = vperm.xlu2 %1849, %v2403_v4   ;;  %v742_v4 = vadd.s32 4294967295, %v2650_v21 }
 0x45c   : > { %v741_v21 = vpop.permute.xlu1 %740 }
 0x45d   : > { %1819 = vrot.lane.b32.xlu0 %v1823_v41, %s2180_s27  ;;  %810 = vperm.xlu1 %1848, %v2429_v17   ;;  %vm743_vm13 = vcmp.ge.s32.totalorder %v742_v4, 0  ;;  %vm744_vm14 = vcmp.lt.s32.totalorder %v742_v4, 8  ;;  %v1623_v37 = vpack.c.bf16 %v2707_v0, %v741_v21 }
 0x45e   : > { %vm2727_vm3 = vmand %vm743_vm13, %vm744_vm14 }
 0x45f   : > { %vm2744_vm4 = vmand %vm2727_vm3, %vm764_vm5  ;;  %vm1231_vm5 = vcmp.lt.s32.totalorder %v1227_v11, 16 }
 0x460   : > { %vm1616_vm13 = vmpackc.low %vm2736_vm2, %vm2719_vm15  ;;  %vm3093_vm2 = vcmp.ge.s32.totalorder %v2761_v20, 0 }
 0x461   : > { %vm1619_vm14 = vmpackc.low %vm2754_vm6, %vm2744_vm4  ;;  %vm3148_vm6 = vcmp.lt.s32.totalorder %v1116_v7, 16  ;;  %vm1132_vm4 = vcmp.lt.s32.totalorder %v1128_v45, 16 }
 0x462   : > { %vm2775_vm10 = vmand %vm1229_vm11, %vm1231_vm5  ;;  %vm1190_vm5 = vcmp.ge.s32.totalorder %v1117_v9, 0 }
 0x463   : > { %vm2783_vm15 = vmand %vm2727_vm3, %vm747_vm12  ;;  %vm1257_vm12 = vcmp.lt.s32.totalorder %v2433_v19, 111 }
 0x464   : > { %vm2799_vm11 = vmand %vm2775_vm10, %vm3094_vm0 }
 0x465   : > { %1829 = vrot.lane.b32.xlu0 %v1823_v41, %s2181_s16  ;;  %vm1622_vm0 = vmpackc.low %vm2727_vm3, %vm2783_vm15 }
 0x46d   : > { %1844 = vrot.lane.b32.xlu0 %v1823_v41, %s2162_s20  ;;  %s1668_s20 = sshll.u32 %s2258_s17, 3 }
 0x46e   : > { %s1356_s26 = scalar_lea.hbm %s3077_s9, %s1668_s20  ;;  %s1370_s18 = scalar_lea.hbm %s3078_s10, %s1668_s20 }
 0x46f   : > { %s1360_s11 = sshll.u32 %s1356_s26, 4  ;;  %s1374_s5 = sshll.u32 %s1370_s18, 4  ;;  %s1361_s11 = int_to_ptr.hbm [resolvable:$true] %s1360_s11  ;;  %s3003_s5 = int_to_ptr.hbm [resolvable:$true] %s1374_s5 }
 0x470   : > { %s2015_s12 = sshra.s32 %s1361_s11, 4  ;;  %s2016_s12 = int_to_ptr.hbm [resolvable:$true] %s2015_s12 }
 0x471   : > { %s2017_s27 = scalar_lea.hbm %s2016_s12, 8  ;;  %p2022_p11 = scmp.lt.s32.totalorder %s2016_s12, %s3077_s9 }
 0x472   : > { %p2018_p1 = scmp.ne.s32.totalorder %s2016_s12, %s2017_s27 }
 0x474   : > { %p2019_p4 = pnand %p2018_p1, %p2322_p7 }
 0x475   : > { %1278 = vperm.xlu0 %1850, %v2580_v63  }
 0x476   : > { %p2020_p10 = pneg %p2019_p4 }
 0x4a5   : > { %v2709_v32 = vpop.permute.xlu2 %1209 }
 0x4ad   : > { %v2711_v1 = vpop.permute.xlu2 %1839 }
 0x4ae   : > { %v1842_v25 = vunpack.i.h.bf16 %v2711_v1 }
 0x4b5   : > { %v609_v2 = vpop.permute.xlu2 %608 }
 0x4b6   : > { %v629_v17 = vadd.f32 %v2490_v60, %v609_v2 }
 0x4b8   : > { %v632_v63 = vmax.f32 %v629_v17, 0.0 }
 0x4ba   : > { %633 = vst.msk [vmem:[%s494_s4] sm:$0xff] %vm3129_vm9, %v632_v63  ;;  %vm1230_vm9 = vcmp.ge.s32.totalorder %v1228_v13, 0  ;;  %s2021_s4 = scalar_lea.hbm %s3077_s9, 16 }
 0x4bb   : > { %vm2791_vm1 = vmand %vm1230_vm9, %vm1232_vm8  ;;  %p2023_p2 = scmp.lt.s32.totalorder %s2021_s4, %s2017_s27 }
 0x4bc   : > { %vm2808_vm8 = vmand %vm2775_vm10, %vm3093_vm2  ;;  %vm3096_vm2 = vcmp.ge.s32.totalorder %v2788_v28, 0 }
 0x4bd   : > { %vm1263_vm9 = vmand %vm2791_vm1, %vm3095_vm7  ;;  %p2024_p12 = por %p2023_p2, %p2022_p11 }
 0x4be   : > { %vm2847_vm3 = vmand %vm2791_vm1, %vm3096_vm2 }
 0x4bf   : > { %v2748_v14 = vpop.permute.xlu0 %1809  ;;  %v1825_v6 = vpop.permute.xlu1 %1824  ;;  %v3153_v44 = vsel %vm2847_vm3, 4294967295, %v3152_v44  ;;  %p2025_p0 = pnand %p2024_p12, %p2020_p10 }
 0x4c0   : > { %v1811_v18 = vunpack.i.l.bf16 %v2748_v14  ;;  %v1827_v41 = vunpack.i.h.bf16 %v1825_v6  ;;  %v1826_v27 = vunpack.i.l.bf16 %v1825_v6  ;;  %v1812_v59 = vunpack.i.h.bf16 %v2748_v14 }
 0x4c2   : > { %v1617_v23 = vpack.c.bf16 %v1811_v18, %v2499_v26  ;;  %v1841_v26 = vunpack.i.l.bf16 %v2711_v1 }
 0x4c4   : > { %1618 = vmatpush.bf16.msk.msra.mxu0 %vm1616_vm13, %v1617_v23  ;;  %vm1192_vm13 = vcmp.lt.s32.totalorder %v1117_v9, 16 }
 0x4c5   : > { %vm2852_vm15 = vmand %vm1190_vm5, %vm1192_vm13  ;;  %vm1211_vm13 = vcmp.lt.s32.totalorder %v2433_v19, 127 }
 0x4c6   : > { %v1212_v9 = vsel %vm1211_vm13, %v1812_v59, %v2709_v32  ;;  %v1213_v60 = vsel %vm1211_vm13, %v2709_v32, %v1812_v59  ;;  %vm3180_vm13 = vcmp.ge.s32.totalorder %v2761_v20, 0 }
 0x4c7   : > { %v1815_v33 = vpop.permute.xlu0 %1814  ;;  %v1835_v5 = vpop.permute.xlu1 %1834  ;;  %v1641_v55 = vpack.c.bf16 %v1212_v9, %v2675_v50  ;;  %v1654_v13 = vpack.c.bf16 %v1213_v60, %v2677_v51 }
 0x4c8   : > { %v1817_v34 = vunpack.i.h.bf16 %v1815_v33  ;;  %v1816_v35 = vunpack.i.l.bf16 %v1815_v33  ;;  %1621 = vmatpush.bf16.msk.msra.mxu0 %vm1619_vm14, %v1620_v30  ;;  %vm3149_vm14 = vcmp.ge.s32.totalorder %v1116_v7, 0  ;;  %v1837_v11 = vunpack.i.h.bf16 %v1835_v5 }
 0x4c9   : > { %vm2837_vm7 = vmand %vm3149_vm14, %vm3148_vm6  ;;  %vm1131_vm6 = vcmp.lt.s32.totalorder %v1127_v36, 16  ;;  %v1836_v12 = vunpack.i.l.bf16 %v1835_v5 }
 0x4ca   : > { %v1258_v38 = vsel %vm1257_vm12, %v1816_v35, %v1817_v34  ;;  %v1259_v39 = vsel %vm1257_vm12, %v1817_v34, %v1816_v35  ;;  %v1276_v35 = vld [vmem:[#allocation11] sm:$0xf] }
 0x4cb   : > { %v1264_v42 = vsel %vm2799_vm11, %v1258_v38, 0.0  ;;  %v1265_v43 = vsel %vm1263_vm9, %v1259_v39, 0.0  ;;  %vm3156_vm11 = vcmp.lt.s32.totalorder %v2758_v16, 16  ;;  %vm1129_vm9 = vcmp.ge.s32.totalorder %v1127_v36, 0 }
 0x4cc   : > { %1624 = vmatpush.bf16.msk.msra.mxu0 %vm1622_vm0, %v1623_v37  ;;  %v1274_v46 = vpack.c.bf16 %v1264_v42, %v1264_v42  ;;  %v1275_v47 = vpack.c.bf16 %v1265_v43, %v1265_v43  ;;  %vm2860_vm12 = vmand %vm2837_vm7, %vm3156_vm11  ;;  %vm3159_vm0 = vcmask 1043456   ;;  %vm3161_vm11 = vcmp.lt.s32.totalorder %v2767_v22, 16 }
 0x4cd   : > { %v3158_v52 = vsel %vm2860_vm12, 4294967295, %v3157_v52  ;;  %vm3160_vm14 = vmmov %vm3159_vm0 }
 0x4ce   : > { %v1285_v53 = vsel %vm3159_vm0, %v1274_v46, 0  ;;  %v1288_v56 = vsel %vm3160_vm14, %v1275_v47, 0  ;;  %vm2875_vm2 = vmand %vm2852_vm15, %vm3161_vm11  ;;  %vm3164_vm14 = vcmask 588800   ;;  %vm3167_vm0 = vcmp.lt.s32.totalorder %v2433_v19, 112 }
 0x4cf   : > { %v1820_v57 = vpop.permute.xlu0 %1819  ;;  %1306 = vmatpush.bf16.msrb.mxu1 %v1288_v56  ;;  %1625 = vmatmul.msk.bf16.vlgmr.msra.gmra.mxu0 %vm3164_vm14, %v808_v49  ;;  %vm2888_vm11 = vmand %vm1129_vm9, %vm1131_vm6  ;;  %v1245_v4 = vsel %vm3167_vm0, %v1826_v27, %v1827_v41  ;;  %vm3169_vm14 = vcmp.lt.s32.totalorder %v2433_v19, 113  ;;  %vm3171_vm6 = vcmp.ge.s32.totalorder %v1128_v45, 0 }
 0x4d0   : > { %1293 = vmatpush.bf16.msrb.mxu0 %v1285_v53  ;;  %v1822_v61 = vunpack.i.h.bf16 %v1820_v57  ;;  %v1821_v62 = vunpack.i.l.bf16 %v1820_v57  ;;  %vm3168_vm3 = vmmov %vm3167_vm0  ;;  %vm3178_vm0 = vnez %v3153_v44 }
 0x4d1   : > { %v1246_v2 = vsel %vm3168_vm3, %v1827_v41, %v1826_v27  ;;  %vm3170_vm5 = vmmov %vm3169_vm14  ;;  %vm3174_vm3 = vcmp.lt.s32.totalorder %v2758_v16, 16 }
 0x4d2   : > { %v1225_v17 = vsel %vm3169_vm14, %v1821_v62, %v1822_v61  ;;  %v1226_v3 = vsel %vm3170_vm5, %v1822_v61, %v1821_v62  ;;  %vm1653_vm9 = vmpackc.low %vm2875_vm2, %vm2852_vm15 }
 0x4d3   : > { %v1638_v63 = vpack.c.bf16 %v1245_v4, %v1225_v17  ;;  %v1651_v7 = vpack.c.bf16 %v1246_v2, %v1226_v3  ;;  %vm2905_vm12 = vmand %vm3171_vm6, %vm1132_vm4 }
 0x4d4   : > { %vm2915_vm5 = vmand %vm2888_vm11, %vm3174_vm3  ;;  %vm3183_vm3 = vcmp.lt.s32.totalorder %v2767_v22, 16 }
 0x4d5   : > { %vm3177_vm4 = vmpackc.low %vm2775_vm10, %vm2808_vm8  ;;  %vm1167_vm8 = vcmp.lt.s32.totalorder %v2433_v19, 15 }
 0x4d6   : > { %1639 = vmatpush.bf16.msk.msrb.mxu0 %vm3177_vm4, %v1638_v63  ;;  %vm3179_vm14 = vmpackc.low %vm2791_vm1, %vm3178_vm0  ;;  %vm1186_vm1 = vcmp.lt.s32.totalorder %v2433_v19, 1  ;;  %vm3186_vm4 = vcmp.ge.s32.totalorder %v2788_v28, 0 }
 0x4d7   : > { %1652 = vmatpush.bf16.msk.msrb.mxu1 %vm3179_vm14, %v1651_v7  ;;  %vm2933_vm6 = vmand %vm2837_vm7, %vm3180_vm13  ;;  %v1830_v14 = vpop.permute.xlu0 %1829  ;;  %vm3187_vm14 = vnez %v3158_v52  ;;  %v1187_v50 = vsel %vm1186_vm1, %v1836_v12, %v1837_v11  ;;  %v1188_v51 = vsel %vm1186_vm1, %v1837_v11, %v1836_v12 }
 0x4d8   : > { %vm2941_vm10 = vmand %vm2905_vm12, %vm3183_vm3  ;;  %v1832_v15 = vunpack.i.h.bf16 %v1830_v14  ;;  %v1831_v16 = vunpack.i.l.bf16 %v1830_v14 }
 0x4d9   : > { %vm1196_vm0 = vmand %vm2852_vm15, %vm3186_vm4  ;;  %vm1124_vm15 = vcmp.lt.s32.totalorder %v2433_v19, 17 }
 0x4da   : > { %vm3188_vm13 = vmpackc.low %vm3187_vm14, %vm2837_vm7  ;;  %v1168_v18 = vsel %vm1167_vm8, %v1831_v16, %v1832_v15  ;;  %v1169_v21 = vsel %vm1167_vm8, %v1832_v15, %v1831_v16  ;;  %vm3189_vm7 = vcmp.ge.s32.totalorder %v2761_v20, 0  ;;  %v1125_v1 = vsel %vm1124_vm15, %v1841_v26, %v1842_v25 }
 0x4db   : > { %1642 = vmatpush.bf16.msk.msrb.mxu0 %vm3188_vm13, %v1641_v55  ;;  %1655 = vmatpush.bf16.msk.msrb.mxu1 %vm1653_vm9, %v1654_v13  ;;  %vm1643_vm3 = vmpackc.low %vm2933_vm6, %vm2915_vm5  ;;  %v1644_v22 = vpack.c.bf16 %v1188_v51, %v1169_v21  ;;  %v1657_v23 = vpack.c.bf16 %v1187_v50, %v1168_v18  ;;  %vm3190_vm9 = vcmp.ge.s32.totalorder %v2788_v28, 0  ;;  %v1126_v33 = vsel %vm1124_vm15, %v1842_v25, %v1841_v26 }
 0x4dc   : > { %vm1656_vm4 = vmpackc.low %vm1196_vm0, %vm2941_vm10  ;;  %vm3191_vm10 = vcmp.lt.s32.totalorder %v2433_v19, 16  ;;  %vm3193_vm0 = vcmask 588800   ;;  %v811_v19 = vpop.permute.xlu1 %810 }
 0x4dd   : > { %vm1139_vm2 = vmand %vm2888_vm11, %vm3189_vm7 }
 0x4de   : > { %vm1140_vm5 = vmand %vm2905_vm12, %vm3190_vm9 }
 0x4df   : > { %1645 = vmatpush.bf16.msk.msrb.mxu0 %vm1643_vm3, %v1644_v22  ;;  %1658 = vmatpush.bf16.msk.msrb.mxu1 %vm1656_vm4, %v1657_v23  ;;  %v1845_v29 = vpop.permute.xlu0 %1844  ;;  %vm1646_vm6 = vmpackc.low %vm2888_vm11, %vm1139_vm2 }
 0x4e0   : > { %v1847_v30 = vunpack.i.h.bf16 %v1845_v29  ;;  %v1846_v31 = vunpack.i.l.bf16 %v1845_v29  ;;  %vm3192_vm1 = vmmov %vm3191_vm10 }
 0x4e1   : > { %vm1659_vm8 = vmpackc.low %vm2905_vm12, %vm1140_vm5  ;;  %vm3195_vm12 = vcmask 523264  }
 0x4e2   : > { %v1151_v20 = vsel %vm3191_vm10, %v1846_v31, %v1847_v30  ;;  %v1152_v24 = vsel %vm3192_vm1, %v1847_v30, %v1846_v31  ;;  %vm3194_vm11 = vmmov %vm3193_vm0 }
 0x4e3   : > { %v1647_v28 = vpack.c.bf16 %v1152_v24, %v1126_v33  ;;  %v1660_v34 = vpack.c.bf16 %v1151_v20, %v1125_v1 }
 0x4e5   : > { %1648 = vmatpush.bf16.msk.msrb.mxu0 %vm1646_vm6, %v1647_v28  ;;  %1661 = vmatpush.bf16.msk.msrb.mxu1 %vm1659_vm8, %v1660_v34 }
 0x4e8   : > { %1649 = vmatmul.msk.bf16.vlgmr.msrb.gmra.mxu0 %vm3193_vm0, %v1276_v35  ;;  %1662 = vmatmul.msk.bf16.vlgmr.msrb.gmra.mxu1 %vm3194_vm11, %v1276_v35 }
 0x54c   : > { %v828_v6 = vpop.f32.mrf.mxu0 }
 0x54d   : > { %v829_v36 = vadd.f32 %v828_v6, %v811_v19 }
 0x54f   : > { %v832_v37 = vmax.f32 %v829_v36, 0.0 }
 0x551   : > { %833 = vst.msk [vmem:[%s487_s28] sm:$0xff] %vm3195_vm12, %v832_v37 }
 0x552   : > { %2028 = shalt.err (!%p2025_p0)
}
 0x553   : > { %1693 = dma.vmem_to_hbm [thread:$0]  (%p2322_p7), %s1359_s6, 128, %s1361_s11, %s1326_s21  }
 0x554   : > { %s2043_s13 = sshra.s32 %s3003_s5, 4  ;;  %s2049_s24 = scalar_lea.hbm %s3078_s10, 16  ;;  %s2044_s13 = int_to_ptr.hbm [resolvable:$true] %s2043_s13 }
 0x555   : > { %s2045_s23 = scalar_lea.hbm %s2044_s13, 8  ;;  %p2050_p5 = scmp.lt.s32.totalorder %s2044_s13, %s3078_s10 }
 0x556   : > { %p2046_p9 = scmp.ne.s32.totalorder %s2044_s13, %s2045_s23  ;;  %p2051_p8 = scmp.lt.s32.totalorder %s2049_s24, %s2045_s23 }
 0x558   : > { %p2047_p13 = pnand %p2046_p9, %p2322_p7  ;;  %p2052_p1 = por %p2051_p8, %p2050_p5 }
 0x55a   : > { %p2048_p3 = pneg %p2047_p13 }
 0x55c   : > { %p2053_p4 = pnand %p2052_p1, %p2048_p3 }
 0x55e   : > { %2056 = shalt.err (!%p2053_p4)
}
 0x55f   : > { %1694 = dma.vmem_to_hbm [thread:$0]  (%p2322_p7), %s1373_s29, 128, %s3003_s5, %s1326_s21   ;;  %v830_v38 = vpop.f32.mrf.mxu0  ;;  %v1279_v39 = vpop.permute.xlu0 %1278 }
 0x560   : > { %s1588_s6 = sshll.u32 %s2368_s15, 4  ;;  %s1674_s11 = sshll.u32 %s2258_s17, 4 }
 0x561   : > { %s1342_s22 = scalar_lea.hbm %s3076_s8, %s1674_s11  ;;  %s480_s16 = scalar_lea.vmem [#allocation12], %s1588_s6 }
 0x562   : > { %s1344_s4 = sshll.u32 %s480_s16, 4  ;;  %s1346_s20 = sshll.u32 %s1342_s22, 4  ;;  %s1345_s4 = int_to_ptr.vmem [resolvable:$true] %s1344_s4  ;;  %s1347_s20 = int_to_ptr.hbm [resolvable:$true] %s1346_s20 }
 0x563   : > { %s1321_s17 = scalar_lea.sflag [#allocation5], %s2368_s15  ;;  %s2071_s5 = sshra.s32 %s1347_s20, 4  ;;  %s2072_s5 = int_to_ptr.hbm [resolvable:$true] %s2071_s5 }
 0x564   : > { %s2073_s29 = scalar_lea.hbm %s2072_s5, 16  ;;  %s2077_s13 = scalar_lea.hbm %s3076_s8, 32 }
 0x565   : > { %v1312_v42 = vpop.f32.mrf.mxu1  ;;  %p2074_p10 = scmp.ne.s32.totalorder %s2072_s5, %s2073_s29  ;;  %p2078_p12 = scmp.lt.s32.totalorder %s2072_s5, %s3076_s8 }
 0x566   : > { %v1313_v44 = vadd.f32 %v1312_v42, %v1279_v39  ;;  %p2079_p0 = scmp.lt.s32.totalorder %s2077_s13, %s2073_s29 }
 0x567   : > { %v1299_v40 = vpop.f32.mrf.mxu0  ;;  %p2075_p11 = pnand %p2074_p10, %p2322_p7 }
 0x568   : > { %v1300_v43 = vadd.f32 %v1299_v40, %v1279_v39  ;;  %v1317_v46 = vmax.f32 %v1313_v44, 0.0  ;;  %p2080_p9 = por %p2079_p0, %p2078_p12 }
 0x569   : > { %p2076_p2 = pneg %p2075_p11 }
 0x56a   : > { %v1316_v45 = vmax.f32 %v1300_v43, 0.0  ;;  %1319 = vst [vmem:[%s480_s16 + $0x8] sm:$0xff] %v1317_v46 }
 0x56b   : > { %p2081_p13 = pnand %p2080_p9, %p2076_p2 }
 0x56c   : > { %1318 = vst [vmem:[%s480_s16] sm:$0xff] %v1316_v45 }
 0x56d   : > { %2084 = shalt.err (!%p2081_p13)
}
 0x56e   : > { %1692 = dma.vmem_to_hbm [thread:$0]  (%p2322_p7), %s1345_s4, 256, %s1347_s20, %s1321_s17   ;;  %v1314_v48 = vpop.f32.mrf.mxu1 }
 0x56f   : > { %v1301_v47 = vpop.f32.mrf.mxu0 }
 0x570 PF: > { %s3196_s15 = sld [smem:[#allocation22_spill]] }
 0x571   : > { %s3198_s24 = sld [smem:[#allocation24_spill]] }
 0x576   : > { %s1386_s18 = sand.u32 1, %s3196_s15  }
 0x577   : > { %p3199_p3 = scmp.ge.s32.totalorder %s3198_s24, 2  ;;  %s1387_s28 = scalar_lea.sflag [#allocation5], %s1386_s18 }
 0x579   : > { %p1716_p5 = pnand %p3199_p3, %p2274_p6 }
 0x57b   : > { %p1717_p8 = pneg %p1716_p5 }
 0x57d   : > { %2118 = dma.done.wait (%p1717_p8), %s1387_s28, 256  }
 0x57e   : > { %2120 = vsyncadd (%p1717_p8), %s1387_s28, 4294967040  ;;  %s3200_s6 = sadd.s32 4294967294, %s3198_s24  }
 0x57f   : > { %s1396_s11 = sand.u32 1, %s3200_s6  }
 0x580   : > { %s1397_s12 = scalar_lea.sflag [#allocation14], %s1396_s11 }
 0x581   : > { %2122 = dma.done.wait (%p1717_p8), %s1397_s12, 256  }
 0x582   : > { %2124 = vsyncadd (%p1717_p8), %s1397_s12, 4294967040  ;;  %s3201_s16 = sld [smem:[#allocation26_spill]]  ;;  %s3204_s13 = smov %s2131_s14 }
 0x583   : > { %s3202_s25 = sld [smem:[#allocation23_spill]] }
 0x584   : > { %s3203_s15 = sld [smem:[#allocation27_spill]] }
 0x588   : > { %p31_p7 = scmp.ge.s32.totalorder %s3201_s16, 4  }
 0x589   : > { %s3205_s14 = smov %s3202_s25 }
 0x58a   :  { %33 = sbr.rel (!%p31_p7) target bundleno = 14 (0xe), region = 161 }
 0x58f   :  { %1413 = vsyncpa [#allocation4], 1 }
 0x590   :  { %1415 = vsyncpa [#allocation4 + $0x1], 1 }
 0x591   :  { %1416 = vsyncpa [#allocation7], 1 }
 0x592   :  { %1418 = vsyncpa [#allocation7 + $0x1], 1 }
 0x593   :  { %1419 = vsyncpa [#allocation10], 1 }
 0x594   :  { %1420 = vsyncpa [#allocation5], 1 }
 0x595   :  { %1422 = vsyncpa [#allocation5 + $0x1], 1 }
 0x596   :  { %1423 = vsyncpa [#allocation14], 1 }
 0x597   :  { %1425 = vsyncpa [#allocation14 + $0x1], 1 }

</bundles_post_ra>
